<compile_context>
chip_gen: v7x
topology: tpu7x:2x2x1
jax: 0.10.0
libtpu: 0.0.40
codegen_flags: <defaults>
</compile_context>

<pallas_src>
import math

import jax
import jax.numpy as jnp
from jax.experimental import pallas as pl
from jax.experimental.pallas import tpu as pltpu


def _round_up(x, m):
    return (x + m - 1) // m * m


def _mwgcn_kernel(adj_ref, s_ref, bsum_ref, o_ref):
    # grid = (i: row tile [parallel], r: relation [arbitrary], k: contraction [arbitrary])
    r = pl.program_id(1)
    k = pl.program_id(2)

    @pl.when((r == 0) & (k == 0))
    def _init():
        # Output tile is VMEM-resident across the (r, k) reduction axes;
        # initialise it once with the hoisted bias sum (broadcast over rows).
        o_ref[...] = jnp.zeros_like(o_ref) + bsum_ref[...]

    # Cast the adjacency tile to bf16 on the fly (no materialised bf16 copy of
    # A in HBM); S is already bf16.  Accumulate in f32 directly into o_ref.
    a = adj_ref[...].astype(jnp.bfloat16)
    o_ref[...] += jnp.dot(a, s_ref[...], preferred_element_type=jnp.float32)


def _pick_tile(n_pad, prefer_multi_tile):
    """Largest tile in {512, 256, 128} dividing n_pad (optionally with >=2 tiles)."""
    if prefer_multi_tile:
        for t in (512, 256, 128):
            if n_pad % t == 0 and n_pad // t >= 2:
                return t
    for t in (512, 256, 128):
        if n_pad % t == 0:
            return t
    return 128  # unreachable: n_pad is a multiple of 128


def _vmem_limit_bytes(tile_m, tile_k, o_pad, adj_itemsize):
    need = (2 * tile_m * tile_k * adj_itemsize   # A tiles, double-buffered
            + 2 * tile_k * o_pad * 2             # S tiles (bf16), double-buffered
            + 2 * tile_m * o_pad * 4             # output tiles (f32), double-buffered
            + 2 * o_pad * 4)                     # bias row
    # 2x headroom + 4 MiB, clamped to [8 MiB, 32 MiB] (portable to v7x's 64 MiB VMEM).
    return int(min(32 * 1024 * 1024, max(2 * need + (4 << 20), 8 << 20)))


def mwgcn_wot_forward(adj, x, w, b, *, tile_m=None, tile_k=None,
                      min_pallas_nodes=512):
    """adj: (R,N,N), x: (R,N,D), w: (R,D,O), b: (R,O) -> (N,O) f32.

    Adjacency may be f32 (cast to bf16 per tile inside the kernel) or already
    bf16 / another narrow dtype (streamed as-is, halving the dominant HBM
    stream).  TODO(synk): int8-MXU adjacency path for v5e/v6e not implemented.
    """
    R, N, D = x.shape
    O = w.shape[-1]

    # Toy-shape regime: grid/DMA overhead dominates; plain XLA is strictly faster.
    if N < min_pallas_nodes:
        support = jnp.einsum('rnd,rdo->rno', x.astype(jnp.float32),
                             w.astype(jnp.float32))
        out = jnp.einsum('rij,rjo->io', adj.astype(jnp.float32), support)
        return out + jnp.sum(b.astype(jnp.float32), axis=0)

    o_pad = _round_up(O, 128)
    n_pad = _round_up(N, 128)

    if tile_k is None:
        tile_k = _pick_tile(n_pad, prefer_multi_tile=False)
    if tile_m is None:
        # Keep >=2 row tiles so v7x's 2 TensorCores can split the "parallel" axis.
        tile_m = _pick_tile(n_pad, prefer_multi_tile=True)

    # Hoisted: S_r = X_r @ W_r in f32 (tiny vs. the A stream), one cast to bf16.
    w_p = w if o_pad == O else jnp.pad(w, ((0, 0), (0, 0), (0, o_pad - O)))
    s = jnp.einsum('rnd,rdo->rno', x.astype(jnp.float32),
                   w_p.astype(jnp.float32)).astype(jnp.bfloat16)

    # Hoisted bias: sum_r b_r (added once when each output tile is initialised).
    bsum = jnp.sum(b.astype(jnp.float32), axis=0)
    bsum_p = (bsum if o_pad == O else jnp.pad(bsum, (0, o_pad - O))).reshape(1, o_pad)

    # Pad node dimension only when not tile-aligned (zero rows/cols are exact).
    if n_pad != N:
        adj_p = jnp.pad(adj, ((0, 0), (0, n_pad - N), (0, n_pad - N)))
        s_p = jnp.pad(s, ((0, 0), (0, n_pad - N), (0, 0)))
    else:
        adj_p, s_p = adj, s

    grid = (n_pad // tile_m, R, n_pad // tile_k)

    out_padded = pl.pallas_call(
        _mwgcn_kernel,
        out_shape=jax.ShapeDtypeStruct((n_pad, o_pad), jnp.float32),
        grid_spec=pltpu.PrefetchScalarGridSpec(
            num_scalar_prefetch=0,
            grid=grid,
            in_specs=[
                # A_r[i, k]  (relation dim squeezed -> 2-D tile in kernel)
                pl.BlockSpec((None, tile_m, tile_k), lambda i, r, k: (r, i, k)),
                # S_r[k]
                pl.BlockSpec((None, tile_k, o_pad), lambda i, r, k: (r, k, 0)),
                # sum_r b_r
                pl.BlockSpec((1, o_pad), lambda i, r, k: (0, 0)),
            ],
            out_specs=pl.BlockSpec((tile_m, o_pad), lambda i, r, k: (i, 0)),
        ),
        compiler_params=pltpu.CompilerParams(
            dimension_semantics=("parallel", "arbitrary", "arbitrary"),
            vmem_limit_bytes=_vmem_limit_bytes(tile_m, tile_k, o_pad,
                                               jnp.dtype(adj_p.dtype).itemsize),
        ),
    )(adj_p, s_p, bsum_p)

    if n_pad != N or o_pad != O:
        return out_padded[:N, :O]
    return out_padded


def _kaiming_uniform(key, shape):
    # torch.nn.init.kaiming_uniform_ defaults (a=0, leaky_relu):
    # gain = sqrt(2), fan_in = shape[1] for a 2-D tensor -> bound = sqrt(6/fan_in)
    fan_in = shape[1]
    bound = math.sqrt(6.0 / fan_in)
    return jax.random.uniform(key, shape, jnp.float32, -bound, bound)


if __name__ == "__main__":
    # rel_num relations, N graph nodes, input_dim D, output_dim O.
    # N chosen large enough to exercise the tiled Pallas path (>=2 row tiles,
    # >=2 contraction tiles) while staying small in absolute memory (~8 MiB adj).
    R = 2
    N = 1024
    D = 64
    O = 96   # non-multiple of 128 -> exercises lane padding of the output

    key = jax.random.PRNGKey(0)
    k_adj, k_x, k_w = jax.random.split(key, 3)

    # Parameter init per module __init__: kaiming_uniform_ weights, zero biases.
    w_keys = jax.random.split(k_w, R)
    w = jnp.stack([_kaiming_uniform(w_keys[i], (D, O)) for i in range(R)])  # (R,D,O)
    b = jnp.zeros((R, O), jnp.float32)                                      # (R,O)

    # Example inputs: per-relation node features and (densified) adjacency.
    x = jax.random.normal(k_x, (R, N, D), jnp.float32)
    adj = jax.random.uniform(k_adj, (R, N, N), jnp.float32)

    fwd = jax.jit(mwgcn_wot_forward)
    out = jax.block_until_ready(fwd(adj, x, w, b))

    # Pure-JAX f32 reference.
    ref = jnp.zeros((N, O), jnp.float32)
    for r in range(R):
        support = x[r] @ w[r]
        ref = ref + adj[r] @ support + b[r]

    assert out.shape == (N, O)
    max_err = float(jnp.max(jnp.abs(out - ref)))
    scale = float(jnp.max(jnp.abs(ref)))
    # bf16 input streams with f32 accumulation -> loose tolerance vs f32 reference.
    assert max_err <= 2e-2 * scale + 1e-1, f"mismatch: max_err={max_err}, scale={scale}"
    print("KERNEL_OK")
</pallas_src>

<mosaic_0001>
module attributes {stable_mosaic.version = 11 : i64} {
  func.func @_mwgcn_kernel(%arg0: i32, %arg1: i32, %arg2: i32, %arg3: memref<1x512x512xf32, #tpu.memory_space<vmem>>, %arg4: memref<1x512x128xbf16, #tpu.memory_space<vmem>>, %arg5: memref<1x128xf32, #tpu.memory_space<vmem>>, %arg6: memref<512x128xf32, #tpu.memory_space<vmem>>) attributes {dimension_semantics = [#tpu.dimension_semantics<parallel>, #tpu.dimension_semantics<arbitrary>, #tpu.dimension_semantics<arbitrary>], iteration_bounds = array<i64: 2, 2, 2>, scalar_prefetch = 0 : i64, scratch_operands = 0 : i64, tpu.core_type = #tpu.core_type<tc>, window_params = [{transform_indices = @transform_0, window_bounds = array<i64: 1, 512, 512>}, {transform_indices = @transform_1, window_bounds = array<i64: 1, 512, 128>}, {pipeline_mode = #tpu.pipeline_mode<synchronous>, transform_indices = @transform_2, window_bounds = array<i64: 1, 128>}, {transform_indices = @transform_3, window_bounds = array<i64: 512, 128>}]} {
    %c0_i32 = arith.constant 0 : i32
    %0 = arith.cmpi eq, %arg1, %c0_i32 : i32
    %c0_i32_0 = arith.constant 0 : i32
    %1 = arith.cmpi eq, %arg2, %c0_i32_0 : i32
    %2 = arith.andi %0, %1 : i1
    %3 = arith.extui %2 : i1 to i32
    %c0_i32_1 = arith.constant 0 : i32
    %4 = arith.cmpi ne, %3, %c0_i32_1 : i32
    scf.if %4 {
      %cst_11 = arith.constant 0.000000e+00 : f32
      %14 = vector.broadcast %cst_11 : f32 to vector<512x128xf32>
      %c0_12 = arith.constant 0 : index
      %c0_13 = arith.constant 0 : index
      %15 = vector.load %arg5[%c0_12, %c0_13] : memref<1x128xf32, #tpu.memory_space<vmem>>, vector<1x128xf32>
      %16 = vector.broadcast %15 : vector<1x128xf32> to vector<512x128xf32>
      %17 = arith.addf %14, %16 : vector<512x128xf32>
      %c0_14 = arith.constant 0 : index
      %c0_15 = arith.constant 0 : index
      %18 = vector.load %arg6[%c0_14, %c0_15] : memref<512x128xf32, #tpu.memory_space<vmem>>, vector<512x128xf32>
      tpu.vector_store %arg6[%c0_14, %c0_15], %17 {strides = array<i32>} : memref<512x128xf32, #tpu.memory_space<vmem>>, vector<512x128xf32>,
    } else {
    }
    %c0 = arith.constant 0 : index
    %c0_2 = arith.constant 0 : index
    %c0_3 = arith.constant 0 : index
    %5 = vector.load %arg3[%c0, %c0_2, %c0_3] : memref<1x512x512xf32, #tpu.memory_space<vmem>>, vector<1x512x512xf32>
    %6 = vector.shape_cast %5 : vector<1x512x512xf32> to vector<512x512xf32>
    %7 = arith.truncf %6 : vector<512x512xf32> to vector<512x512xbf16>
    %c0_4 = arith.constant 0 : index
    %c0_5 = arith.constant 0 : index
    %8 = vector.load %arg6[%c0_4, %c0_5] : memref<512x128xf32, #tpu.memory_space<vmem>>, vector<512x128xf32>
    %c0_6 = arith.constant 0 : index
    %c0_7 = arith.constant 0 : index
    %c0_8 = arith.constant 0 : index
    %9 = vector.load %arg4[%c0_6, %c0_7, %c0_8] : memref<1x512x128xbf16, #tpu.memory_space<vmem>>, vector<1x512x128xbf16>
    %10 = vector.shape_cast %9 : vector<1x512x128xbf16> to vector<512x128xbf16>
    %cst = arith.constant dense<0.000000e+00> : vector<512x128xf32>
    %11 = tpu.matmul %7, %10, %cst {dimension_numbers = #tpu.dot_dimension_numbers<[1], [0], [0], [1], [0, 0, 1, 1], [], []>} : vector<512x512xbf16>, vector<512x128xbf16>, vector<512x128xf32> -> vector<512x128xf32>
    %12 = arith.addf %8, %11 : vector<512x128xf32>
    %c0_9 = arith.constant 0 : index
    %c0_10 = arith.constant 0 : index
    %13 = vector.load %arg6[%c0_9, %c0_10] : memref<512x128xf32, #tpu.memory_space<vmem>>, vector<512x128xf32>
    tpu.vector_store %arg6[%c0_9, %c0_10], %12 {strides = array<i32>} : memref<512x128xf32, #tpu.memory_space<vmem>>, vector<512x128xf32>,
    return
  }
  func.func @transform_0(%arg0: i32, %arg1: i32, %arg2: i32) -> (i32, i32, i32) {
    %c0_i32 = arith.constant 0 : i32
    return %arg1, %arg0, %arg2 : i32, i32, i32
  }
  func.func @transform_1(%arg0: i32, %arg1: i32, %arg2: i32) -> (i32, i32, i32) {
    %c0_i32 = arith.constant 0 : i32
    %c0_i32_0 = arith.constant 0 : i32
    return %arg1, %arg2, %c0_i32 : i32, i32, i32
  }
  func.func @transform_2(%arg0: i32, %arg1: i32, %arg2: i32) -> (i32, i32) {
    %c0_i32 = arith.constant 0 : i32
    %c0_i32_0 = arith.constant 0 : i32
    %c0_i32_1 = arith.constant 0 : i32
    return %c0_i32, %c0_i32_0 : i32, i32
  }
  func.func @transform_3(%arg0: i32, %arg1: i32, %arg2: i32) -> (i32, i32) {
    %c0_i32 = arith.constant 0 : i32
    %c0_i32_0 = arith.constant 0 : i32
    return %arg0, %c0_i32 : i32, i32
  }
}

</mosaic_0001>

<bundles_post_ra>
// kernel: mwgcn_wot_forward.1
= control target key start
LH: loop header
LB: loop body
LE: loop exit
PB: predicated region body
PF: predicated region fallthrough
CT: control target
= control target key end

     0   :  { %s2936_s0 = inlined_call_operand.hbm [shape: f32[2,1024,1024], index: 0, kind: input, shape index: {}]   ;;  %s2937_s1 = inlined_call_operand.vmem [shape: bf16[2,1024,128], index: 1, kind: input, shape index: {}]   ;;  %s2938_s2 = inlined_call_operand.vmem [shape: f32[1,128], index: 2, kind: input, shape index: {}]   ;;  %s2939_s3 = inlined_call_operand.vmem [shape: f32[1024,128], index: 3, kind: output, shape index: {}]  }
   0x1   :  { %2943 = sst [smem:[#allocation9_spill]] %s2937_s1 }
   0x2   :  { %2944 = sst [smem:[#allocation10_spill]] %s2938_s2 }
   0x3   :  { %2945 = sst [smem:[#allocation11_spill]] %s2939_s3 }
   0x4   :  { %8 = vsyncpa [#allocation3], 0 }
   0x5   :  { %10 = vsyncpa [#allocation3 + $0x1], 0  ;;  %s2170_s12 = smov 0   ;;  %s2172_s13 = smov 0  }
   0x6   :  { %s2174_s14 = smov 0   ;;  %s2176_s15 = smov 0  }
   0x7   :  { %s2178_s16 = smov 0   ;;  %s2180_s17 = smov 0  }
   0x8   :  { %s2182_s18 = smov 0   ;;  %s2184_s19 = smov 0  }
   0x9   :  { %s2186_s20 = smov 0   ;;  %s2188_s21 = smov 0  }
   0xa LB: > { %2946 = sst [smem:[#allocation5_spill]] %s2127_s17  ;;  %s1855_s22 = sadd.s32 4294967295, %s2143_s21   ;;  %s2143_s21 = sphi %s2188_s21, %s16_s21   ;;  %s2139_s20 = sphi %s2186_s20, %s2966_s20   ;;  %s2135_s19 = sphi %s2184_s19, %s2965_s19   ;;  %s2131_s18 = sphi %s2182_s18, %s2958_s18   ;;  %s2127_s17 = sphi %s2180_s17, %s2964_s17   ;;  %s2123_s16 = sphi %s2178_s16, %s2963_s16   ;;  %s2119_s15 = sphi %s2176_s15, %s2957_s15   ;;  %s2115_s14 = sphi %s2174_s14, %s2962_s14   ;;  %s2111_s13 = sphi %s2172_s13, %s2961_s13   ;;  %s2107_s12 = sphi %s2170_s12, %s2960_s12  }
   0xb   : > { %2947 = sst [smem:[#allocation6_spill]] %s2131_s18  ;;  %s28_s23 = sadd.s32 1, %s2131_s18 }
   0xc   : > { %p29_p0 = scmp.ge.s32.totalorder %s28_s23, 2  ;;  %s31_s24 = sadd.s32 1, %s2135_s19 }
   0xd   : > { %s35_s25 = sadd.s32 1, %s2139_s20  ;;  %s46_s26 = sadd.s32 1, %s2115_s14 }
   0xe   : > { %s2968_s23 = smov (%p29_p0, %s28_s23), 0  ;;  %s2970_s24 = smov (!%p29_p0, %s31_s24), %s2135_s19 }
   0xf   : > { %2948 = sst [smem:[#allocation7_spill]] %s2968_s23  ;;  %s42_s27 = ssub.s32 %s2131_s18, %s2968_s23 }
  0x10   : > { %p53_p1 = scmp.ne.s32.totalorder %s2115_s14, %s2111_s13  ;;  %p33_p2 = scmp.ge.s32.totalorder %s2970_s24, 2 }
  0x11   : > { %p54_p3 = scmp.eq.s32.totalorder %s2143_s21, 0  ;;  %p59_p4 = scmp.ne.s32.totalorder %s2111_s13, %s2107_s12 }
  0x12   : > { %p60_p5 = scmp.eq.s32.totalorder %s1855_s22, 0  ;;  %s2972_s24 = smov (%p33_p2, %s2970_s24), 0 }
  0x13   : > { %2949 = sst [smem:[#allocation8_spill]] %s2972_s24  ;;  %s2974_s25 = smov (!%p33_p2, %s35_s25), %s2139_s20 }
  0x14   : > { %s39_s28 = ssub.s32 %s2135_s19, %s2972_s24  ;;  %p2237_p6 = por %p54_p3, %p53_p1 }
  0x15   : > { %p37_p7 = scmp.ge.s32.totalorder %s2974_s25, 2  ;;  %p2241_p8 = por %p60_p5, %p59_p4 }
  0x16   : > { %p1914_p9 = scmp.lt.s32.totalorder %s2143_s21, 8  ;;  %s161_s4 = sand.u32 1, %s2115_s14  }
  0x17   : > { %s2976_s25 = smov (%p37_p7, %s2974_s25), 0  ;;  %s1861_s5 = sshll.u32 %s2131_s18, 2 }
  0x18   : > { %s40_s6 = ssub.s32 %s2139_s20, %s2976_s25  ;;  %s1859_s8 = sshll.u32 %s161_s4, 11 }
  0x19   : > { %s41_s7 = sor.u32 %s40_s6, %s39_s28  ;;  %s1907_s10 = sshll.u32 %s2139_s20, 9 }
  0x1a   : > { %s43_s9 = sor.u32 %s42_s27, %s41_s7  ;;  %s172_s11 = sadd.s32 %s1907_s10, %s1861_s5 }
  0x1b   : > { %p44_p10 = scmp.eq.s32.totalorder %s43_s9, 0  ;;  %s1863_s12 = sshll.u32 %s2135_s19, 10 }
  0x1c   : > { %s174_s24 = sadd.s32 %s1863_s12, %s172_s11  ;;  %s165_s23 = scalar_lea.vmem [#allocation2], %s1859_s8 }
  0x1d   : > { %s2255_s22 = scalar_select %p44_p10, %s2115_s14, %s46_s26  }
  0x1e   : > { %s177_s2 = sshll.u32 %s165_s23, 4  ;;  %s1864_s3 = sshll.u32 %s174_s24, 7  ;;  %s2257_s2 = int_to_ptr.vmem [resolvable:$true] %s177_s2 }
  0x1f   : > { %s2262_s17 = scalar_lea.hbm %s2936_s0, %s1864_s3  ;;  %p2268_p11 = pnand %p1914_p9, %p2237_p6 }
  0x20   : > { %s2272_s23 = scalar_lea.sflag [#allocation3], %s161_s4  ;;  %s2031_s24 = scalar_lea.hbm %s2262_s17, 32768 }
  0x21   : > { %p2032_p12 = scmp.ne.s32.totalorder %s2262_s17, %s2031_s24  ;;  %p2033_p13 = pneg %p2268_p11 }
  0x22   : > { %s2036_s18 = scalar_lea.hbm %s2936_s0, 262144  ;;  %p2037_p2 = scmp.lt.u32.totalorder %s2262_s17, %s2936_s0 }
  0x23   : > { %p2034_p0 = pnand %p2033_p13, %p2032_p12  ;;  %p2038_p3 = scmp.lt.u32.totalorder %s2036_s18, %s2031_s24 }
  0x24   : > { %p2040_p5 = scmp.lt.u32.totalorder %s2031_s24, %s2262_s17 }
  0x25   : > { %p2035_p1 = pneg %p2034_p0  ;;  %p2039_p4 = por %p2038_p3, %p2037_p2 }
  0x27   : > { %p2041_p6 = por %p2040_p5, %p2039_p4 }
  0x29   : > { %p2042_p7 = pnand %p2041_p6, %p2035_p1 }
  0x2b   : > { %2045 = shalt.err (!%p2042_p7)
}
  0x2c   : > { %s2046_s29 = scalar_lea.vmem %s2257_s2, 32768  ;;  %s2145_s4 = smov [#allocation2]  }
  0x2d   : > { %p2047_p9 = scmp.ne.s32.totalorder %s2257_s2, %s2046_s29  ;;  %s2051_s5 = sshll.u32 %s2145_s4, 4  ;;  %s2052_s5 = int_to_ptr.vmem [resolvable:$false] %s2051_s5 }
  0x2e   : > { %s2053_s6 = scalar_lea.vmem %s2052_s5, 65536  ;;  %p2054_p0 = scmp.lt.s32.totalorder %s2257_s2, %s2052_s5 }
  0x2f   : > { %p2049_p10 = pnand %p2047_p9, %p2033_p13  ;;  %p2055_p2 = scmp.lt.s32.totalorder %s2053_s6, %s2046_s29 }
  0x31   : > { %p2050_p12 = pneg %p2049_p10  ;;  %p2056_p3 = por %p2055_p2, %p2054_p0 }
  0x33   : > { %p2057_p4 = pnand %p2056_p3, %p2050_p12 }
  0x35   : > { %2060 = shalt.err (!%p2057_p4)
}
  0x36   : > { %s2146_s7 = smov 1024   ;;  %s2147_s8 = smov 512  }
  0x37   : > { %s2148_s9 = smov 32   ;;  %p1865_p13 = scmp.ge.s32.totalorder %s2143_s21, 1 }
  0x38   : > { %1913 = dma.hbm_to_vmem [thread:$0]  (!%p2268_p11), %s2262_s17, 32768, %s2257_s2, %s2272_s23, %s2146_s7, %s2147_s8, %s2148_s9  }
  0x39   : > { %p198_p1 = scmp.lt.s32.totalorder %s2143_s21, 9 }
  0x3b   : > { %p199_p5 = pnand %p1865_p13, %p198_p1 }
  0x3c   : > { %s204_s10 = sand.u32 (!%p199_p5), 1, %s2111_s13  }
  0x3d   : > { %202 = sbr.rel (%p199_p5) target bundleno = 649 (0x289), region = 32  ;;  %s1866_s11 = sshll.u32 (!%p199_p5), %s204_s10, 11 }
  0x3e   : > { %s205_s12 = scalar_lea.sflag (!%p199_p5), [#allocation3], %s204_s10  ;;  %s2303_s24 = scalar_lea.vmem (!%p199_p5), [#allocation2], %s1866_s11 }
  0x44   : > { %2102 = dma.done.wait (%p2241_p8), %s205_s12, 32768  }
  0x45   : > { %2104 = vsyncadd (%p2241_p8), %s205_s12, 4294934528  ;;  %s2953_s26 = sld [smem:[#allocation5_spill]]  ;;  %s1867_s2 = sshll.u32 %s2119_s15, 6 }
  0x46   : > { %p243_p11 = scmp.lt.s32.totalorder %s2123_s16, 1  ;;  %p245_p6 = scmp.lt.s32.totalorder %s1867_s2, 127 }
  0x47   : > { %p259_p9 = scmp.eq.s32.totalorder %s2123_s16, 0  ;;  %p260_p10 = scmp.eq.s32.totalorder %s2119_s15, 0 }
  0x48   : > { %s244_s23 = scalar_select %p243_p11, %s2123_s16, 1 }
  0x49   : > { %s2978_s2 = smov (!%p245_p6, %s1867_s2), 127  ;;  %s2954_s28 = sld [smem:[#allocation9_spill]] }
  0x4a   : > { %s1868_s1 = sshll.u32 %s244_s23, 7  ;;  %p261_p8 = pnand %p260_p10, %p259_p9 }
  0x4b   : > { %s1870_s17 = sshll.u32 %s2953_s26, 6  ;;  %s248_s3 = sadd.s32 %s1868_s1, %s2978_s2 }
  0x4c   : > { %p253_p7 = scmp.lt.s32.totalorder %s1870_s17, 127  ;;  %s1869_s18 = sshll.u32 %s248_s3, 2 }
  0x4d   : > { %s2955_s7 = sld [smem:[#allocation11_spill]]  ;;  %264 = sbr.rel (%p261_p8) target bundleno = 117 (0x75), region = 40 }
  0x4e   : > { %s2980_s17 = smov (!%p253_p7, %s1870_s17), 127  ;;  %s2956_s11 = sld [smem:[#allocation10_spill]] (!%p261_p8) }
  0x4f   : > { %s2318_s29 = scalar_lea.vmem %s2954_s28, %s1869_s18  ;;  %s1871_s4 = sshll.u32 %s2980_s17, 3 }
  0x53   : > { %s2323_s8 = scalar_lea.vmem %s2955_s7, %s1871_s4 }
  0x54   : > { %v2328_v0 = vld [vmem:[%s2956_s11] ss:$0 sm:$0xff] }
  0x55   : > { %273 = vst [vmem:[%s2323_s8] sm:$0xff] %v2328_v0  ;;  %274 = vst [vmem:[%s2323_s8 + $0x8] sm:$0xff] %v2328_v0 }
  0x56   : > { %275 = vst [vmem:[%s2323_s8 + $0x10] sm:$0xff] %v2328_v0  ;;  %276 = vst [vmem:[%s2323_s8 + $0x18] sm:$0xff] %v2328_v0 }
  0x57   : > { %277 = vst [vmem:[%s2323_s8 + $0x20] sm:$0xff] %v2328_v0  ;;  %278 = vst [vmem:[%s2323_s8 + $0x28] sm:$0xff] %v2328_v0 }
  0x58   : > { %279 = vst [vmem:[%s2323_s8 + $0x30] sm:$0xff] %v2328_v0  ;;  %280 = vst [vmem:[%s2323_s8 + $0x38] sm:$0xff] %v2328_v0 }
  0x59   : > { %281 = vst [vmem:[%s2323_s8 + $0x40] sm:$0xff] %v2328_v0  ;;  %282 = vst [vmem:[%s2323_s8 + $0x48] sm:$0xff] %v2328_v0 }
  0x5a   : > { %283 = vst [vmem:[%s2323_s8 + $0x50] sm:$0xff] %v2328_v0  ;;  %284 = vst [vmem:[%s2323_s8 + $0x58] sm:$0xff] %v2328_v0 }
  0x5b   : > { %285 = vst [vmem:[%s2323_s8 + $0x60] sm:$0xff] %v2328_v0  ;;  %286 = vst [vmem:[%s2323_s8 + $0x68] sm:$0xff] %v2328_v0 }
  0x5c   : > { %287 = vst [vmem:[%s2323_s8 + $0x70] sm:$0xff] %v2328_v0  ;;  %288 = vst [vmem:[%s2323_s8 + $0x78] sm:$0xff] %v2328_v0 }
  0x5d   : > { %289 = vst [vmem:[%s2323_s8 + $0x80] sm:$0xff] %v2328_v0  ;;  %290 = vst [vmem:[%s2323_s8 + $0x88] sm:$0xff] %v2328_v0 }
  0x5e   : > { %291 = vst [vmem:[%s2323_s8 + $0x90] sm:$0xff] %v2328_v0  ;;  %292 = vst [vmem:[%s2323_s8 + $0x98] sm:$0xff] %v2328_v0 }
  0x5f   : > { %293 = vst [vmem:[%s2323_s8 + $0xa0] sm:$0xff] %v2328_v0  ;;  %294 = vst [vmem:[%s2323_s8 + $0xa8] sm:$0xff] %v2328_v0 }
  0x60   : > { %295 = vst [vmem:[%s2323_s8 + $0xb0] sm:$0xff] %v2328_v0  ;;  %296 = vst [vmem:[%s2323_s8 + $0xb8] sm:$0xff] %v2328_v0 }
  0x61   : > { %297 = vst [vmem:[%s2323_s8 + $0xc0] sm:$0xff] %v2328_v0  ;;  %298 = vst [vmem:[%s2323_s8 + $0xc8] sm:$0xff] %v2328_v0 }
  0x62   : > { %299 = vst [vmem:[%s2323_s8 + $0xd0] sm:$0xff] %v2328_v0  ;;  %300 = vst [vmem:[%s2323_s8 + $0xd8] sm:$0xff] %v2328_v0 }
  0x63   : > { %301 = vst [vmem:[%s2323_s8 + $0xe0] sm:$0xff] %v2328_v0  ;;  %302 = vst [vmem:[%s2323_s8 + $0xe8] sm:$0xff] %v2328_v0 }
  0x64   : > { %303 = vst [vmem:[%s2323_s8 + $0xf0] sm:$0xff] %v2328_v0  ;;  %304 = vst [vmem:[%s2323_s8 + $0xf8] sm:$0xff] %v2328_v0 }
  0x65   : > { %305 = vst [vmem:[%s2323_s8 + $0x100] sm:$0xff] %v2328_v0  ;;  %306 = vst [vmem:[%s2323_s8 + $0x108] sm:$0xff] %v2328_v0 }
  0x66   : > { %307 = vst [vmem:[%s2323_s8 + $0x110] sm:$0xff] %v2328_v0  ;;  %308 = vst [vmem:[%s2323_s8 + $0x118] sm:$0xff] %v2328_v0 }
  0x67   : > { %309 = vst [vmem:[%s2323_s8 + $0x120] sm:$0xff] %v2328_v0  ;;  %310 = vst [vmem:[%s2323_s8 + $0x128] sm:$0xff] %v2328_v0 }
  0x68   : > { %311 = vst [vmem:[%s2323_s8 + $0x130] sm:$0xff] %v2328_v0  ;;  %312 = vst [vmem:[%s2323_s8 + $0x138] sm:$0xff] %v2328_v0 }
  0x69   : > { %313 = vst [vmem:[%s2323_s8 + $0x140] sm:$0xff] %v2328_v0  ;;  %314 = vst [vmem:[%s2323_s8 + $0x148] sm:$0xff] %v2328_v0 }
  0x6a   : > { %315 = vst [vmem:[%s2323_s8 + $0x150] sm:$0xff] %v2328_v0  ;;  %316 = vst [vmem:[%s2323_s8 + $0x158] sm:$0xff] %v2328_v0 }
  0x6b   : > { %317 = vst [vmem:[%s2323_s8 + $0x160] sm:$0xff] %v2328_v0  ;;  %318 = vst [vmem:[%s2323_s8 + $0x168] sm:$0xff] %v2328_v0 }
  0x6c   : > { %319 = vst [vmem:[%s2323_s8 + $0x170] sm:$0xff] %v2328_v0  ;;  %320 = vst [vmem:[%s2323_s8 + $0x178] sm:$0xff] %v2328_v0 }
  0x6d   : > { %321 = vst [vmem:[%s2323_s8 + $0x180] sm:$0xff] %v2328_v0  ;;  %322 = vst [vmem:[%s2323_s8 + $0x188] sm:$0xff] %v2328_v0 }
  0x6e   : > { %323 = vst [vmem:[%s2323_s8 + $0x190] sm:$0xff] %v2328_v0  ;;  %324 = vst [vmem:[%s2323_s8 + $0x198] sm:$0xff] %v2328_v0 }
  0x6f   : > { %325 = vst [vmem:[%s2323_s8 + $0x1a0] sm:$0xff] %v2328_v0  ;;  %326 = vst [vmem:[%s2323_s8 + $0x1a8] sm:$0xff] %v2328_v0 }
  0x70   : > { %327 = vst [vmem:[%s2323_s8 + $0x1b0] sm:$0xff] %v2328_v0  ;;  %328 = vst [vmem:[%s2323_s8 + $0x1b8] sm:$0xff] %v2328_v0 }
  0x71   : > { %329 = vst [vmem:[%s2323_s8 + $0x1c0] sm:$0xff] %v2328_v0  ;;  %330 = vst [vmem:[%s2323_s8 + $0x1c8] sm:$0xff] %v2328_v0 }
  0x72   : > { %331 = vst [vmem:[%s2323_s8 + $0x1d0] sm:$0xff] %v2328_v0  ;;  %332 = vst [vmem:[%s2323_s8 + $0x1d8] sm:$0xff] %v2328_v0 }
  0x73   : > { %333 = vst [vmem:[%s2323_s8 + $0x1e0] sm:$0xff] %v2328_v0  ;;  %334 = vst [vmem:[%s2323_s8 + $0x1e8] sm:$0xff] %v2328_v0 }
  0x74   : > { %335 = vst [vmem:[%s2323_s8 + $0x1f0] sm:$0xff] %v2328_v0  ;;  %336 = vst [vmem:[%s2323_s8 + $0x1f8] sm:$0xff] %v2328_v0 }
  0x75 PF: > { %v1999_v1 = vld [vmem:[%s2318_s29] sm:$0xff]   ;;  %v2149_v2 = vmov 0   ;;  %v2001_v4 = vld [vmem:[%s2318_s29 + $0x8] sm:$0xff]   ;;  %v2003_v6 = vld [vmem:[%s2318_s29 + $0x10] sm:$0xff]  }
  0x76   : > { %1041 = vmatprep.subr.bf16.mxu0 %v2149_v2  ;;  %1330 = vmatprep.subr.bf16.mxu1 %v2149_v2  ;;  %v2000_v3 = vld [vmem:[%s2318_s29 + $0x80] sm:$0xff]   ;;  %v2002_v5 = vld [vmem:[%s2318_s29 + $0x88] sm:$0xff]   ;;  %v2004_v7 = vld [vmem:[%s2318_s29 + $0x90] sm:$0xff]  }
  0x77   : > { %1042 = vmatpush1.bf16.msra.mxu0 %v1999_v1  ;;  %1331 = vmatpush1.bf16.msra.mxu1 %v2000_v3  ;;  %v2005_v8 = vld [vmem:[%s2318_s29 + $0x18] sm:$0xff]   ;;  %v2007_v10 = vld [vmem:[%s2318_s29 + $0x20] sm:$0xff]   ;;  %v2009_v12 = vld [vmem:[%s2318_s29 + $0x28] sm:$0xff]  }
  0x78   : > { %1043 = vmatprep.subr.bf16.mxu0 %v2149_v2  ;;  %1332 = vmatprep.subr.bf16.mxu1 %v2149_v2  ;;  %v2006_v9 = vld [vmem:[%s2318_s29 + $0x98] sm:$0xff]   ;;  %v2008_v11 = vld [vmem:[%s2318_s29 + $0xa0] sm:$0xff]   ;;  %v2010_v13 = vld [vmem:[%s2318_s29 + $0xa8] sm:$0xff]  }
  0x79   : > { %v2011_v14 = vld [vmem:[%s2318_s29 + $0x30] sm:$0xff]   ;;  %v2013_v16 = vld [vmem:[%s2318_s29 + $0x38] sm:$0xff]   ;;  %v2015_v18 = vld [vmem:[%s2318_s29 + $0x40] sm:$0xff]  }
  0x7a   : > { %v2012_v15 = vld [vmem:[%s2318_s29 + $0xb0] sm:$0xff]   ;;  %v2014_v17 = vld [vmem:[%s2318_s29 + $0xb8] sm:$0xff]   ;;  %v2016_v19 = vld [vmem:[%s2318_s29 + $0xc0] sm:$0xff]  }
  0x7b   : > { %1044 = vmatpush1.bf16.msra.mxu0 %v2001_v4  ;;  %1333 = vmatpush1.bf16.msra.mxu1 %v2002_v5  ;;  %v338_v20 = vld [vmem:[%s2303_s24 + $0x8] sm:$0xff]  ;;  %v340_v22 = vld [vmem:[%s2303_s24 + $0x18] sm:$0xff]  ;;  %v2019_v28 = vld [vmem:[%s2318_s29 + $0x50] sm:$0xff]  }
  0x7c   : > { %1045 = vmatprep.subr.bf16.mxu0 %v2149_v2  ;;  %1334 = vmatprep.subr.bf16.mxu1 %v2149_v2  ;;  %v342_v21 = vld [vmem:[%s2303_s24 + $0x28] sm:$0xff]  ;;  %v344_v24 = vld [vmem:[%s2303_s24 + $0x38] sm:$0xff]  ;;  %v2020_v29 = vld [vmem:[%s2318_s29 + $0xd0] sm:$0xff]  }
  0x7d   : > { %v594_v23 = vpack.c.bf16 %v342_v21, %v338_v20  ;;  %v2017_v25 = vld [vmem:[%s2318_s29 + $0x48] sm:$0xff]   ;;  %v596_v26 = vpack.c.bf16 %v344_v24, %v340_v22  ;;  %v2021_v30 = vld [vmem:[%s2318_s29 + $0x58] sm:$0xff]   ;;  %v2023_v32 = vld [vmem:[%s2318_s29 + $0x60] sm:$0xff]  }
  0x7e   : > { %v2018_v27 = vld [vmem:[%s2318_s29 + $0xc8] sm:$0xff]   ;;  %v2022_v31 = vld [vmem:[%s2318_s29 + $0xd8] sm:$0xff]   ;;  %v2024_v33 = vld [vmem:[%s2318_s29 + $0xe0] sm:$0xff]  }
  0x7f   : > { %1046 = vmatpush1.bf16.msra.mxu0 %v2003_v6  ;;  %1335 = vmatpush1.bf16.msra.mxu1 %v2004_v7  ;;  %v2025_v34 = vld [vmem:[%s2318_s29 + $0x68] sm:$0xff]   ;;  %v2027_v36 = vld [vmem:[%s2318_s29 + $0x70] sm:$0xff]   ;;  %v2029_v38 = vld [vmem:[%s2318_s29 + $0x78] sm:$0xff]  }
  0x80   : > { %1047 = vmatprep.subr.bf16.mxu0 %v2149_v2  ;;  %1336 = vmatprep.subr.bf16.mxu1 %v2149_v2  ;;  %v2026_v35 = vld [vmem:[%s2318_s29 + $0xe8] sm:$0xff]   ;;  %v2028_v37 = vld [vmem:[%s2318_s29 + $0xf0] sm:$0xff]   ;;  %v2030_v39 = vld [vmem:[%s2318_s29 + $0xf8] sm:$0xff]  }
  0x81   : > { %1073 = vmatprep.mubr.bf16.mxu0 %v594_v23  ;;  %1362 = vmatprep.mubr.bf16.mxu1 %v596_v26  ;;  %v337_v40 = vld [vmem:[%s2303_s24] sm:$0xff]  ;;  %v339_v42 = vld [vmem:[%s2303_s24 + $0x10] sm:$0xff]  ;;  %v346_v44 = vld [vmem:[%s2303_s24 + $0x48] sm:$0xff] }
  0x82   : > { %v341_v41 = vld [vmem:[%s2303_s24 + $0x20] sm:$0xff]  ;;  %v343_v43 = vld [vmem:[%s2303_s24 + $0x30] sm:$0xff]  ;;  %v350_v45 = vld [vmem:[%s2303_s24 + $0x68] sm:$0xff] }
  0x83   : > { %1048 = vmatpush1.bf16.msra.mxu0 %v2005_v8  ;;  %1337 = vmatpush1.bf16.msra.mxu1 %v2006_v9  ;;  %v348_v46 = vld [vmem:[%s2303_s24 + $0x58] sm:$0xff]  ;;  %v593_v48 = vpack.c.bf16 %v341_v41, %v337_v40  ;;  %v595_v49 = vpack.c.bf16 %v343_v43, %v339_v42  ;;  %v598_v50 = vpack.c.bf16 %v350_v45, %v346_v44  ;;  %v345_v52 = vld [vmem:[%s2303_s24 + $0x40] sm:$0xff]  ;;  %v347_v54 = vld [vmem:[%s2303_s24 + $0x50] sm:$0xff] }
  0x84   : > { %1049 = vmatprep.subr.bf16.mxu0 %v2149_v2  ;;  %1338 = vmatprep.subr.bf16.mxu1 %v2149_v2  ;;  %v352_v47 = vld [vmem:[%s2303_s24 + $0x78] sm:$0xff]  ;;  %v349_v53 = vld [vmem:[%s2303_s24 + $0x60] sm:$0xff]  ;;  %v351_v55 = vld [vmem:[%s2303_s24 + $0x70] sm:$0xff] }
  0x85   : > { %v600_v51 = vpack.c.bf16 %v352_v47, %v348_v46  ;;  %v354_v56 = vld [vmem:[%s2303_s24 + $0x88] sm:$0xff]  ;;  %v356_v58 = vld [vmem:[%s2303_s24 + $0x98] sm:$0xff]  ;;  %v597_v60 = vpack.c.bf16 %v349_v53, %v345_v52  ;;  %v599_v61 = vpack.c.bf16 %v351_v55, %v347_v54  ;;  %v353_v0 = vld [vmem:[%s2303_s24 + $0x80] sm:$0xff] }
  0x86   : > { %v358_v57 = vld [vmem:[%s2303_s24 + $0xa8] sm:$0xff]  ;;  %v360_v59 = vld [vmem:[%s2303_s24 + $0xb8] sm:$0xff]  ;;  %v357_v1 = vld [vmem:[%s2303_s24 + $0xa0] sm:$0xff] }
  0x87   : > { %1050 = vmatpush1.bf16.msra.mxu0 %v2007_v10  ;;  %1339 = vmatpush1.bf16.msra.mxu1 %v2008_v11  ;;  %v602_v62 = vpack.c.bf16 %v358_v57, %v354_v56  ;;  %v604_v63 = vpack.c.bf16 %v360_v59, %v356_v58  ;;  %v359_v3 = vld [vmem:[%s2303_s24 + $0xb0] sm:$0xff]  ;;  %v362_v4 = vld [vmem:[%s2303_s24 + $0xc8] sm:$0xff]  ;;  %v364_v6 = vld [vmem:[%s2303_s24 + $0xd8] sm:$0xff]  ;;  %v601_v8 = vpack.c.bf16 %v357_v1, %v353_v0 }
  0x88   : > { %1051 = vmatprep.subr.bf16.mxu0 %v2149_v2  ;;  %1340 = vmatprep.subr.bf16.mxu1 %v2149_v2  ;;  %v366_v5 = vld [vmem:[%s2303_s24 + $0xe8] sm:$0xff]  ;;  %v368_v7 = vld [vmem:[%s2303_s24 + $0xf8] sm:$0xff]  ;;  %v369_v24 = vld [vmem:[%s2303_s24 + $0x100] sm:$0xff] }
  0x89   : > { %v606_v10 = vpack.c.bf16 %v366_v5, %v362_v4  ;;  %v608_v11 = vpack.c.bf16 %v368_v7, %v364_v6  ;;  %v371_v26 = vld [vmem:[%s2303_s24 + $0x110] sm:$0xff]  ;;  %v386_v40 = vld [vmem:[%s2303_s24 + $0x188] sm:$0xff]  ;;  %v388_v42 = vld [vmem:[%s2303_s24 + $0x198] sm:$0xff] }
  0x8a   : > { %v390_v41 = vld [vmem:[%s2303_s24 + $0x1a8] sm:$0xff]  ;;  %v392_v43 = vld [vmem:[%s2303_s24 + $0x1b8] sm:$0xff] }
  0x8b   : > { %1052 = vmatpush1.bf16.msra.mxu0 %v2009_v12  ;;  %1341 = vmatpush1.bf16.msra.mxu1 %v2010_v13  ;;  %v361_v12 = vld [vmem:[%s2303_s24 + $0xc0] sm:$0xff]  ;;  %v618_v46 = vpack.c.bf16 %v390_v41, %v386_v40  ;;  %v620_v47 = vpack.c.bf16 %v392_v43, %v388_v42  ;;  %v394_v52 = vld [vmem:[%s2303_s24 + $0x1c8] sm:$0xff]  ;;  %v396_v54 = vld [vmem:[%s2303_s24 + $0x1d8] sm:$0xff] }
  0x8c   : > { %1053 = vmatprep.subr.bf16.mxu0 %v2149_v2  ;;  %1342 = vmatprep.subr.bf16.mxu1 %v2149_v2  ;;  %v365_v13 = vld [vmem:[%s2303_s24 + $0xe0] sm:$0xff]  ;;  %v398_v53 = vld [vmem:[%s2303_s24 + $0x1e8] sm:$0xff]  ;;  %v400_v55 = vld [vmem:[%s2303_s24 + $0x1f8] sm:$0xff] }
  0x8d   : > { %v605_v20 = vpack.c.bf16 %v365_v13, %v361_v12  ;;  %v622_v58 = vpack.c.bf16 %v398_v53, %v394_v52  ;;  %v624_v59 = vpack.c.bf16 %v400_v55, %v396_v54  ;;  %v402_v0 = vld [vmem:[%s2303_s24 + $0x208] sm:$0xff] }
  0x8e   : > { %v406_v1 = vld [vmem:[%s2303_s24 + $0x228] sm:$0xff] }
  0x8f   : > { %1054 = vmatpush1.bf16.msra.mxu0 %v2011_v14  ;;  %1343 = vmatpush1.bf16.msra.mxu1 %v2012_v15  ;;  %v363_v14 = vld [vmem:[%s2303_s24 + $0xd0] sm:$0xff]  ;;  %v626_v6 = vpack.c.bf16 %v406_v1, %v402_v0  ;;  %v410_v12 = vld [vmem:[%s2303_s24 + $0x248] sm:$0xff] }
  0x90   : > { %1055 = vmatprep.subr.bf16.mxu0 %v2149_v2  ;;  %1344 = vmatprep.subr.bf16.mxu1 %v2149_v2  ;;  %v367_v15 = vld [vmem:[%s2303_s24 + $0xf0] sm:$0xff]  ;;  %v414_v13 = vld [vmem:[%s2303_s24 + $0x268] sm:$0xff] }
  0x91   : > { %v607_v21 = vpack.c.bf16 %v367_v15, %v363_v14  ;;  %v412_v14 = vld [vmem:[%s2303_s24 + $0x258] sm:$0xff] }
  0x92   : > { %v416_v15 = vld [vmem:[%s2303_s24 + $0x278] sm:$0xff] }
  0x93   : > { %1056 = vmatpush1.bf16.msra.mxu0 %v2013_v16  ;;  %1345 = vmatpush1.bf16.msra.mxu1 %v2014_v17  ;;  %v370_v16 = vld [vmem:[%s2303_s24 + $0x108] sm:$0xff] }
  0x94   : > { %1057 = vmatprep.subr.bf16.mxu0 %v2149_v2  ;;  %1346 = vmatprep.subr.bf16.mxu1 %v2149_v2  ;;  %v374_v17 = vld [vmem:[%s2303_s24 + $0x128] sm:$0xff] }
  0x95   : > { %v610_v22 = vpack.c.bf16 %v374_v17, %v370_v16 }
  0x97   : > { %1058 = vmatpush1.bf16.msra.mxu0 %v2015_v18  ;;  %1347 = vmatpush1.bf16.msra.mxu1 %v2016_v19  ;;  %v372_v18 = vld [vmem:[%s2303_s24 + $0x118] sm:$0xff] }
  0x98   : > { %1059 = vmatprep.subr.bf16.mxu0 %v2149_v2  ;;  %1348 = vmatprep.subr.bf16.mxu1 %v2149_v2  ;;  %v376_v19 = vld [vmem:[%s2303_s24 + $0x138] sm:$0xff] }
  0x99   : > { %v612_v23 = vpack.c.bf16 %v376_v19, %v372_v18  ;;  %v630_v18 = vpack.c.bf16 %v414_v13, %v410_v12  ;;  %v632_v19 = vpack.c.bf16 %v416_v15, %v412_v14 }
  0x9b   : > { %1060 = vmatpush1.bf16.msra.mxu0 %v2017_v25  ;;  %1349 = vmatpush1.bf16.msra.mxu1 %v2018_v27  ;;  %v373_v25 = vld [vmem:[%s2303_s24 + $0x120] sm:$0xff]  ;;  %v375_v27 = vld [vmem:[%s2303_s24 + $0x130] sm:$0xff] }
  0x9c   : > { %1061 = vmatprep.subr.bf16.mxu0 %v2149_v2  ;;  %1350 = vmatprep.subr.bf16.mxu1 %v2149_v2 }
  0x9f   : > { %1062 = vmatpush1.bf16.msra.mxu0 %v2019_v28  ;;  %1351 = vmatpush1.bf16.msra.mxu1 %v2020_v29  ;;  %v378_v28 = vld [vmem:[%s2303_s24 + $0x148] sm:$0xff] }
  0xa0   : > { %1063 = vmatprep.subr.bf16.mxu0 %v2149_v2  ;;  %1352 = vmatprep.subr.bf16.mxu1 %v2149_v2  ;;  %v382_v29 = vld [vmem:[%s2303_s24 + $0x168] sm:$0xff] }
  0xa3   : > { %1064 = vmatpush1.bf16.msra.mxu0 %v2021_v30  ;;  %1353 = vmatpush1.bf16.msra.mxu1 %v2022_v31  ;;  %v380_v30 = vld [vmem:[%s2303_s24 + $0x158] sm:$0xff] }
  0xa4   : > { %1065 = vmatprep.subr.bf16.mxu0 %v2149_v2  ;;  %1354 = vmatprep.subr.bf16.mxu1 %v2149_v2  ;;  %v384_v31 = vld [vmem:[%s2303_s24 + $0x178] sm:$0xff] }
  0xa7   : > { %1066 = vmatpush1.bf16.msra.mxu0 %v2023_v32  ;;  %1355 = vmatpush1.bf16.msra.mxu1 %v2024_v33  ;;  %v609_v32 = vpack.c.bf16 %v373_v25, %v369_v24  ;;  %v611_v33 = vpack.c.bf16 %v375_v27, %v371_v26  ;;  %v418_v24 = vld [vmem:[%s2303_s24 + $0x288] sm:$0xff]  ;;  %v420_v26 = vld [vmem:[%s2303_s24 + $0x298] sm:$0xff] }
  0xa8   : > { %1067 = vmatprep.subr.bf16.mxu0 %v2149_v2  ;;  %1356 = vmatprep.subr.bf16.mxu1 %v2149_v2  ;;  %v422_v25 = vld [vmem:[%s2303_s24 + $0x2a8] sm:$0xff]  ;;  %v424_v27 = vld [vmem:[%s2303_s24 + $0x2b8] sm:$0xff] }
  0xab   : > { %1068 = vmatpush1.bf16.msra.mxu0 %v2025_v34  ;;  %1357 = vmatpush1.bf16.msra.mxu1 %v2026_v35  ;;  %v614_v34 = vpack.c.bf16 %v382_v29, %v378_v28  ;;  %v616_v35 = vpack.c.bf16 %v384_v31, %v380_v30  ;;  %v634_v30 = vpack.c.bf16 %v422_v25, %v418_v24 }
  0xac   : > { %1069 = vmatprep.subr.bf16.mxu0 %v2149_v2  ;;  %1358 = vmatprep.subr.bf16.mxu1 %v2149_v2  ;;  %v636_v31 = vpack.c.bf16 %v424_v27, %v420_v26 }
  0xaf   : > { %1070 = vmatpush1.bf16.msra.mxu0 %v2027_v36  ;;  %1359 = vmatpush1.bf16.msra.mxu1 %v2028_v37  ;;  %v377_v36 = vld [vmem:[%s2303_s24 + $0x140] sm:$0xff] }
  0xb0   : > { %1071 = vmatprep.subr.bf16.mxu0 %v2149_v2  ;;  %1360 = vmatprep.subr.bf16.mxu1 %v2149_v2  ;;  %v355_v2 = vld [vmem:[%s2303_s24 + $0x90] sm:$0xff]  ;;  %v381_v37 = vld [vmem:[%s2303_s24 + $0x160] sm:$0xff] }
  0xb1   : > { %v603_v9 = vpack.c.bf16 %v359_v3, %v355_v2  ;;  %v613_v44 = vpack.c.bf16 %v381_v37, %v377_v36  ;;  %v404_v2 = vld [vmem:[%s2303_s24 + $0x218] sm:$0xff]  ;;  %v426_v36 = vld [vmem:[%s2303_s24 + $0x2c8] sm:$0xff] }
  0xb2   : > { %v408_v3 = vld [vmem:[%s2303_s24 + $0x238] sm:$0xff]  ;;  %v430_v37 = vld [vmem:[%s2303_s24 + $0x2e8] sm:$0xff] }
  0xb3   : > { %1072 = vmatpush1.bf16.msra.mxu0 %v2029_v38  ;;  %1361 = vmatpush1.bf16.msra.mxu1 %v2030_v39  ;;  %v379_v38 = vld [vmem:[%s2303_s24 + $0x150] sm:$0xff]  ;;  %v628_v7 = vpack.c.bf16 %v408_v3, %v404_v2  ;;  %v638_v42 = vpack.c.bf16 %v430_v37, %v426_v36 }
  0xb4   : > { %v383_v39 = vld [vmem:[%s2303_s24 + $0x170] sm:$0xff] }
  0xb5   : > { %v615_v45 = vpack.c.bf16 %v383_v39, %v379_v38  ;;  %v428_v38 = vld [vmem:[%s2303_s24 + $0x2d8] sm:$0xff] }
  0xb6   : > { %1074 = vmatmul.mubr.bf16.vlgmr.msra.gmra.mrb[0].mxu0 %v593_v48  ;;  %1363 = vmatmul.mubr.bf16.vlgmr.msra.gmra.mrb[0].mxu1 %v595_v49  ;;  %v385_v48 = vld [vmem:[%s2303_s24 + $0x180] sm:$0xff]  ;;  %v432_v39 = vld [vmem:[%s2303_s24 + $0x2f8] sm:$0xff] }
  0xb7   : > { %1081 = vmatprep.mubr.bf16.mxu0 %v598_v50  ;;  %1370 = vmatprep.mubr.bf16.mxu1 %v600_v51  ;;  %v389_v49 = vld [vmem:[%s2303_s24 + $0x1a0] sm:$0xff]  ;;  %v387_v50 = vld [vmem:[%s2303_s24 + $0x190] sm:$0xff]  ;;  %v640_v43 = vpack.c.bf16 %v432_v39, %v428_v38 }
  0xb8   : > { %v391_v51 = vld [vmem:[%s2303_s24 + $0x1b0] sm:$0xff]  ;;  %v617_v56 = vpack.c.bf16 %v389_v49, %v385_v48  ;;  %v434_v48 = vld [vmem:[%s2303_s24 + $0x308] sm:$0xff] }
  0xb9   : > { %v619_v57 = vpack.c.bf16 %v391_v51, %v387_v50  ;;  %v438_v49 = vld [vmem:[%s2303_s24 + $0x328] sm:$0xff]  ;;  %v436_v50 = vld [vmem:[%s2303_s24 + $0x318] sm:$0xff] }
  0xba   : > { %v440_v51 = vld [vmem:[%s2303_s24 + $0x338] sm:$0xff]  ;;  %v642_v54 = vpack.c.bf16 %v438_v49, %v434_v48 }
  0xbb   : > { %v644_v55 = vpack.c.bf16 %v440_v51, %v436_v50 }
  0xbe   : > { %1082 = vmatmul.mubr.bf16.gmra.mrb[4].mxu0 %v597_v60  ;;  %1371 = vmatmul.mubr.bf16.gmra.mrb[4].mxu1 %v599_v61  ;;  %v393_v60 = vld [vmem:[%s2303_s24 + $0x1c0] sm:$0xff] }
  0xbf   : > { %1089 = vmatprep.mubr.bf16.mxu0 %v602_v62  ;;  %1378 = vmatprep.mubr.bf16.mxu1 %v604_v63  ;;  %v397_v61 = vld [vmem:[%s2303_s24 + $0x1e0] sm:$0xff]  ;;  %v395_v62 = vld [vmem:[%s2303_s24 + $0x1d0] sm:$0xff] }
  0xc0   : > { %v399_v63 = vld [vmem:[%s2303_s24 + $0x1f0] sm:$0xff]  ;;  %v621_v4 = vpack.c.bf16 %v397_v61, %v393_v60  ;;  %v442_v60 = vld [vmem:[%s2303_s24 + $0x348] sm:$0xff] }
  0xc1   : > { %v623_v5 = vpack.c.bf16 %v399_v63, %v395_v62  ;;  %v446_v61 = vld [vmem:[%s2303_s24 + $0x368] sm:$0xff]  ;;  %v444_v62 = vld [vmem:[%s2303_s24 + $0x358] sm:$0xff] }
  0xc2   : > { %v448_v63 = vld [vmem:[%s2303_s24 + $0x378] sm:$0xff]  ;;  %v646_v2 = vpack.c.bf16 %v446_v61, %v442_v60 }
  0xc3   : > { %v648_v3 = vpack.c.bf16 %v448_v63, %v444_v62 }
  0xc6   : > { %1090 = vmatmul.mubr.bf16.gmra.mrb[8].mxu0 %v601_v8  ;;  %1379 = vmatmul.mubr.bf16.gmra.mrb[8].mxu1 %v603_v9  ;;  %v401_v8 = vld [vmem:[%s2303_s24 + $0x200] sm:$0xff] }
  0xc7   : > { %1097 = vmatprep.mubr.bf16.mxu0 %v606_v10  ;;  %1386 = vmatprep.mubr.bf16.mxu1 %v608_v11  ;;  %v405_v9 = vld [vmem:[%s2303_s24 + $0x220] sm:$0xff]  ;;  %v403_v10 = vld [vmem:[%s2303_s24 + $0x210] sm:$0xff] }
  0xc8   : > { %v407_v11 = vld [vmem:[%s2303_s24 + $0x230] sm:$0xff]  ;;  %v625_v16 = vpack.c.bf16 %v405_v9, %v401_v8  ;;  %v450_v8 = vld [vmem:[%s2303_s24 + $0x388] sm:$0xff] }
  0xc9   : > { %v627_v17 = vpack.c.bf16 %v407_v11, %v403_v10  ;;  %v454_v9 = vld [vmem:[%s2303_s24 + $0x3a8] sm:$0xff]  ;;  %v452_v10 = vld [vmem:[%s2303_s24 + $0x398] sm:$0xff] }
  0xca   : > { %v456_v11 = vld [vmem:[%s2303_s24 + $0x3b8] sm:$0xff]  ;;  %v650_v14 = vpack.c.bf16 %v454_v9, %v450_v8 }
  0xcb   : > { %v652_v15 = vpack.c.bf16 %v456_v11, %v452_v10 }
  0xce   : > { %1098 = vmatmul.mubr.bf16.gmra.mrb[12].mxu0 %v605_v20  ;;  %1387 = vmatmul.mubr.bf16.gmra.mrb[12].mxu1 %v607_v21  ;;  %v409_v20 = vld [vmem:[%s2303_s24 + $0x240] sm:$0xff] }
  0xcf   : > { %1105 = vmatprep.mubr.bf16.mxu0 %v610_v22  ;;  %1394 = vmatprep.mubr.bf16.mxu1 %v612_v23  ;;  %v413_v21 = vld [vmem:[%s2303_s24 + $0x260] sm:$0xff]  ;;  %v411_v22 = vld [vmem:[%s2303_s24 + $0x250] sm:$0xff] }
  0xd0   : > { %v415_v23 = vld [vmem:[%s2303_s24 + $0x270] sm:$0xff]  ;;  %v629_v28 = vpack.c.bf16 %v413_v21, %v409_v20  ;;  %v458_v20 = vld [vmem:[%s2303_s24 + $0x3c8] sm:$0xff] }
  0xd1   : > { %v631_v29 = vpack.c.bf16 %v415_v23, %v411_v22  ;;  %v462_v21 = vld [vmem:[%s2303_s24 + $0x3e8] sm:$0xff]  ;;  %v460_v22 = vld [vmem:[%s2303_s24 + $0x3d8] sm:$0xff] }
  0xd2   : > { %v464_v23 = vld [vmem:[%s2303_s24 + $0x3f8] sm:$0xff]  ;;  %v654_v26 = vpack.c.bf16 %v462_v21, %v458_v20 }
  0xd3   : > { %v656_v27 = vpack.c.bf16 %v464_v23, %v460_v22 }
  0xd6   : > { %1106 = vmatmul.mubr.bf16.gmra.mrb[16].mxu0 %v609_v32  ;;  %1395 = vmatmul.mubr.bf16.gmra.mrb[16].mxu1 %v611_v33  ;;  %v417_v32 = vld [vmem:[%s2303_s24 + $0x280] sm:$0xff] }
  0xd7   : > { %1113 = vmatprep.mubr.bf16.mxu0 %v614_v34  ;;  %1402 = vmatprep.mubr.bf16.mxu1 %v616_v35  ;;  %v421_v33 = vld [vmem:[%s2303_s24 + $0x2a0] sm:$0xff]  ;;  %v419_v34 = vld [vmem:[%s2303_s24 + $0x290] sm:$0xff] }
  0xd8   : > { %v423_v35 = vld [vmem:[%s2303_s24 + $0x2b0] sm:$0xff]  ;;  %v633_v40 = vpack.c.bf16 %v421_v33, %v417_v32  ;;  %v466_v32 = vld [vmem:[%s2303_s24 + $0x408] sm:$0xff] }
  0xd9   : > { %v635_v41 = vpack.c.bf16 %v423_v35, %v419_v34  ;;  %v470_v33 = vld [vmem:[%s2303_s24 + $0x428] sm:$0xff]  ;;  %v468_v34 = vld [vmem:[%s2303_s24 + $0x418] sm:$0xff] }
  0xda   : > { %v472_v35 = vld [vmem:[%s2303_s24 + $0x438] sm:$0xff]  ;;  %v658_v38 = vpack.c.bf16 %v470_v33, %v466_v32 }
  0xdb   : > { %v660_v39 = vpack.c.bf16 %v472_v35, %v468_v34 }
  0xde   : > { %1114 = vmatmul.mubr.bf16.gmra.mrb[20].mxu0 %v613_v44  ;;  %1403 = vmatmul.mubr.bf16.gmra.mrb[20].mxu1 %v615_v45  ;;  %v425_v44 = vld [vmem:[%s2303_s24 + $0x2c0] sm:$0xff] }
  0xdf   : > { %1121 = vmatprep.mubr.bf16.mxu0 %v618_v46  ;;  %1410 = vmatprep.mubr.bf16.mxu1 %v620_v47  ;;  %v429_v45 = vld [vmem:[%s2303_s24 + $0x2e0] sm:$0xff]  ;;  %v427_v46 = vld [vmem:[%s2303_s24 + $0x2d0] sm:$0xff] }
  0xe0   : > { %v431_v47 = vld [vmem:[%s2303_s24 + $0x2f0] sm:$0xff]  ;;  %v637_v52 = vpack.c.bf16 %v429_v45, %v425_v44  ;;  %v474_v44 = vld [vmem:[%s2303_s24 + $0x448] sm:$0xff] }
  0xe1   : > { %v639_v53 = vpack.c.bf16 %v431_v47, %v427_v46  ;;  %v478_v45 = vld [vmem:[%s2303_s24 + $0x468] sm:$0xff]  ;;  %v476_v46 = vld [vmem:[%s2303_s24 + $0x458] sm:$0xff] }
  0xe2   : > { %v480_v47 = vld [vmem:[%s2303_s24 + $0x478] sm:$0xff]  ;;  %v662_v50 = vpack.c.bf16 %v478_v45, %v474_v44 }
  0xe3   : > { %v664_v51 = vpack.c.bf16 %v480_v47, %v476_v46 }
  0xe6   : > { %1122 = vmatmul.mubr.bf16.gmra.mrb[24].mxu0 %v617_v56  ;;  %1411 = vmatmul.mubr.bf16.gmra.mrb[24].mxu1 %v619_v57  ;;  %v433_v56 = vld [vmem:[%s2303_s24 + $0x300] sm:$0xff] }
  0xe7   : > { %1129 = vmatprep.mubr.bf16.mxu0 %v622_v58  ;;  %1418 = vmatprep.mubr.bf16.mxu1 %v624_v59  ;;  %v437_v57 = vld [vmem:[%s2303_s24 + $0x320] sm:$0xff]  ;;  %v435_v58 = vld [vmem:[%s2303_s24 + $0x310] sm:$0xff] }
  0xe8   : > { %v439_v59 = vld [vmem:[%s2303_s24 + $0x330] sm:$0xff]  ;;  %v641_v0 = vpack.c.bf16 %v437_v57, %v433_v56  ;;  %v482_v56 = vld [vmem:[%s2303_s24 + $0x488] sm:$0xff] }
  0xe9   : > { %v643_v1 = vpack.c.bf16 %v439_v59, %v435_v58  ;;  %v486_v57 = vld [vmem:[%s2303_s24 + $0x4a8] sm:$0xff]  ;;  %v484_v58 = vld [vmem:[%s2303_s24 + $0x498] sm:$0xff] }
  0xea   : > { %v488_v59 = vld [vmem:[%s2303_s24 + $0x4b8] sm:$0xff]  ;;  %v666_v62 = vpack.c.bf16 %v486_v57, %v482_v56 }
  0xeb   : > { %v668_v63 = vpack.c.bf16 %v488_v59, %v484_v58 }
  0xee   : > { %1130 = vmatmul.mubr.bf16.gmra.mrb[28].mxu0 %v621_v4  ;;  %1419 = vmatmul.mubr.bf16.gmra.mrb[28].mxu1 %v623_v5  ;;  %v441_v4 = vld [vmem:[%s2303_s24 + $0x340] sm:$0xff] }
  0xef   : > { %1137 = vmatprep.mubr.bf16.mxu0 %v626_v6  ;;  %1426 = vmatprep.mubr.bf16.mxu1 %v628_v7  ;;  %v445_v5 = vld [vmem:[%s2303_s24 + $0x360] sm:$0xff]  ;;  %v443_v6 = vld [vmem:[%s2303_s24 + $0x350] sm:$0xff] }
  0xf0   : > { %v447_v7 = vld [vmem:[%s2303_s24 + $0x370] sm:$0xff]  ;;  %v645_v12 = vpack.c.bf16 %v445_v5, %v441_v4  ;;  %v490_v4 = vld [vmem:[%s2303_s24 + $0x4c8] sm:$0xff] }
  0xf1   : > { %v647_v13 = vpack.c.bf16 %v447_v7, %v443_v6  ;;  %v494_v5 = vld [vmem:[%s2303_s24 + $0x4e8] sm:$0xff]  ;;  %v492_v6 = vld [vmem:[%s2303_s24 + $0x4d8] sm:$0xff] }
  0xf2   : > { %v496_v7 = vld [vmem:[%s2303_s24 + $0x4f8] sm:$0xff]  ;;  %v670_v10 = vpack.c.bf16 %v494_v5, %v490_v4 }
  0xf3   : > { %v672_v11 = vpack.c.bf16 %v496_v7, %v492_v6 }
  0xf6   : > { %1138 = vmatmul.mubr.bf16.gmra.mrb[32].mxu0 %v625_v16  ;;  %1427 = vmatmul.mubr.bf16.gmra.mrb[32].mxu1 %v627_v17  ;;  %v449_v16 = vld [vmem:[%s2303_s24 + $0x380] sm:$0xff] }
  0xf7   : > { %1145 = vmatprep.mubr.bf16.mxu0 %v630_v18  ;;  %1434 = vmatprep.mubr.bf16.mxu1 %v632_v19  ;;  %v453_v17 = vld [vmem:[%s2303_s24 + $0x3a0] sm:$0xff]  ;;  %v451_v18 = vld [vmem:[%s2303_s24 + $0x390] sm:$0xff] }
  0xf8   : > { %v455_v19 = vld [vmem:[%s2303_s24 + $0x3b0] sm:$0xff]  ;;  %v649_v24 = vpack.c.bf16 %v453_v17, %v449_v16  ;;  %v498_v16 = vld [vmem:[%s2303_s24 + $0x508] sm:$0xff] }
  0xf9   : > { %v651_v25 = vpack.c.bf16 %v455_v19, %v451_v18  ;;  %v502_v17 = vld [vmem:[%s2303_s24 + $0x528] sm:$0xff]  ;;  %v500_v18 = vld [vmem:[%s2303_s24 + $0x518] sm:$0xff] }
  0xfa   : > { %v504_v19 = vld [vmem:[%s2303_s24 + $0x538] sm:$0xff]  ;;  %v674_v22 = vpack.c.bf16 %v502_v17, %v498_v16 }
  0xfb   : > { %v676_v23 = vpack.c.bf16 %v504_v19, %v500_v18 }
  0xfe   : > { %1146 = vmatmul.mubr.bf16.gmra.mrb[36].mxu0 %v629_v28  ;;  %1435 = vmatmul.mubr.bf16.gmra.mrb[36].mxu1 %v631_v29  ;;  %v457_v28 = vld [vmem:[%s2303_s24 + $0x3c0] sm:$0xff] }
  0xff   : > { %1153 = vmatprep.mubr.bf16.mxu0 %v634_v30  ;;  %1442 = vmatprep.mubr.bf16.mxu1 %v636_v31  ;;  %v461_v29 = vld [vmem:[%s2303_s24 + $0x3e0] sm:$0xff]  ;;  %v459_v30 = vld [vmem:[%s2303_s24 + $0x3d0] sm:$0xff] }
 0x100   : > { %v463_v31 = vld [vmem:[%s2303_s24 + $0x3f0] sm:$0xff]  ;;  %v653_v36 = vpack.c.bf16 %v461_v29, %v457_v28  ;;  %v506_v28 = vld [vmem:[%s2303_s24 + $0x548] sm:$0xff] }
 0x101   : > { %v655_v37 = vpack.c.bf16 %v463_v31, %v459_v30  ;;  %v510_v29 = vld [vmem:[%s2303_s24 + $0x568] sm:$0xff]  ;;  %v508_v30 = vld [vmem:[%s2303_s24 + $0x558] sm:$0xff] }
 0x102   : > { %v512_v31 = vld [vmem:[%s2303_s24 + $0x578] sm:$0xff]  ;;  %v678_v34 = vpack.c.bf16 %v510_v29, %v506_v28 }
 0x103   : > { %v680_v35 = vpack.c.bf16 %v512_v31, %v508_v30 }
 0x106   : > { %1154 = vmatmul.mubr.bf16.gmra.mrb[40].mxu0 %v633_v40  ;;  %1443 = vmatmul.mubr.bf16.gmra.mrb[40].mxu1 %v635_v41  ;;  %v465_v40 = vld [vmem:[%s2303_s24 + $0x400] sm:$0xff] }
 0x107   : > { %1161 = vmatprep.mubr.bf16.mxu0 %v638_v42  ;;  %1450 = vmatprep.mubr.bf16.mxu1 %v640_v43  ;;  %v469_v41 = vld [vmem:[%s2303_s24 + $0x420] sm:$0xff]  ;;  %v467_v42 = vld [vmem:[%s2303_s24 + $0x410] sm:$0xff] }
 0x108   : > { %v471_v43 = vld [vmem:[%s2303_s24 + $0x430] sm:$0xff]  ;;  %v657_v48 = vpack.c.bf16 %v469_v41, %v465_v40  ;;  %v514_v40 = vld [vmem:[%s2303_s24 + $0x588] sm:$0xff] }
 0x109   : > { %v659_v49 = vpack.c.bf16 %v471_v43, %v467_v42  ;;  %v518_v41 = vld [vmem:[%s2303_s24 + $0x5a8] sm:$0xff]  ;;  %v516_v42 = vld [vmem:[%s2303_s24 + $0x598] sm:$0xff] }
 0x10a   : > { %v520_v43 = vld [vmem:[%s2303_s24 + $0x5b8] sm:$0xff]  ;;  %v682_v46 = vpack.c.bf16 %v518_v41, %v514_v40 }
 0x10b   : > { %v684_v47 = vpack.c.bf16 %v520_v43, %v516_v42 }
 0x10e   : > { %1162 = vmatmul.mubr.bf16.gmra.mrb[44].mxu0 %v637_v52  ;;  %1451 = vmatmul.mubr.bf16.gmra.mrb[44].mxu1 %v639_v53  ;;  %v473_v52 = vld [vmem:[%s2303_s24 + $0x440] sm:$0xff] }
 0x10f   : > { %1169 = vmatprep.mubr.bf16.mxu0 %v642_v54  ;;  %1458 = vmatprep.mubr.bf16.mxu1 %v644_v55  ;;  %v477_v53 = vld [vmem:[%s2303_s24 + $0x460] sm:$0xff]  ;;  %v475_v54 = vld [vmem:[%s2303_s24 + $0x450] sm:$0xff] }
 0x110   : > { %v479_v55 = vld [vmem:[%s2303_s24 + $0x470] sm:$0xff]  ;;  %v661_v60 = vpack.c.bf16 %v477_v53, %v473_v52  ;;  %v522_v52 = vld [vmem:[%s2303_s24 + $0x5c8] sm:$0xff] }
 0x111   : > { %v663_v61 = vpack.c.bf16 %v479_v55, %v475_v54  ;;  %v526_v53 = vld [vmem:[%s2303_s24 + $0x5e8] sm:$0xff]  ;;  %v524_v54 = vld [vmem:[%s2303_s24 + $0x5d8] sm:$0xff] }
 0x112   : > { %v528_v55 = vld [vmem:[%s2303_s24 + $0x5f8] sm:$0xff]  ;;  %v686_v58 = vpack.c.bf16 %v526_v53, %v522_v52  ;;  %v721_v53 = vld [vmem:[%s2323_s8] sm:$0xff] }
 0x113   : > { %v688_v59 = vpack.c.bf16 %v528_v55, %v524_v54  ;;  %v568_v52 = vld [vmem:[%s2303_s24 + $0x738] sm:$0xff] }
 0x116   : > { %1170 = vmatmul.mubr.bf16.gmra.mrb[48].mxu0 %v641_v0  ;;  %1459 = vmatmul.mubr.bf16.gmra.mrb[48].mxu1 %v643_v1  ;;  %v481_v0 = vld [vmem:[%s2303_s24 + $0x480] sm:$0xff] }
 0x117   : > { %1177 = vmatprep.mubr.bf16.mxu0 %v646_v2  ;;  %1466 = vmatprep.mubr.bf16.mxu1 %v648_v3  ;;  %v485_v1 = vld [vmem:[%s2303_s24 + $0x4a0] sm:$0xff]  ;;  %v483_v2 = vld [vmem:[%s2303_s24 + $0x490] sm:$0xff] }
 0x118   : > { %v487_v3 = vld [vmem:[%s2303_s24 + $0x4b0] sm:$0xff]  ;;  %v665_v8 = vpack.c.bf16 %v485_v1, %v481_v0  ;;  %v530_v0 = vld [vmem:[%s2303_s24 + $0x608] sm:$0xff] }
 0x119   : > { %v667_v9 = vpack.c.bf16 %v487_v3, %v483_v2  ;;  %v534_v1 = vld [vmem:[%s2303_s24 + $0x628] sm:$0xff]  ;;  %v532_v2 = vld [vmem:[%s2303_s24 + $0x618] sm:$0xff] }
 0x11a   : > { %v536_v3 = vld [vmem:[%s2303_s24 + $0x638] sm:$0xff]  ;;  %v690_v6 = vpack.c.bf16 %v534_v1, %v530_v0 }
 0x11b   : > { %v692_v7 = vpack.c.bf16 %v536_v3, %v532_v2 }
 0x11e   : > { %1178 = vmatmul.mubr.bf16.gmra.mrb[52].mxu0 %v645_v12  ;;  %1467 = vmatmul.mubr.bf16.gmra.mrb[52].mxu1 %v647_v13  ;;  %v489_v12 = vld [vmem:[%s2303_s24 + $0x4c0] sm:$0xff] }
 0x11f   : > { %1185 = vmatprep.mubr.bf16.mxu0 %v650_v14  ;;  %1474 = vmatprep.mubr.bf16.mxu1 %v652_v15  ;;  %v493_v13 = vld [vmem:[%s2303_s24 + $0x4e0] sm:$0xff]  ;;  %v491_v14 = vld [vmem:[%s2303_s24 + $0x4d0] sm:$0xff] }
 0x120   : > { %v495_v15 = vld [vmem:[%s2303_s24 + $0x4f0] sm:$0xff]  ;;  %v669_v20 = vpack.c.bf16 %v493_v13, %v489_v12  ;;  %v538_v12 = vld [vmem:[%s2303_s24 + $0x648] sm:$0xff] }
 0x121   : > { %v671_v21 = vpack.c.bf16 %v495_v15, %v491_v14  ;;  %v542_v13 = vld [vmem:[%s2303_s24 + $0x668] sm:$0xff]  ;;  %v540_v14 = vld [vmem:[%s2303_s24 + $0x658] sm:$0xff] }
 0x122   : > { %v544_v15 = vld [vmem:[%s2303_s24 + $0x678] sm:$0xff]  ;;  %v694_v18 = vpack.c.bf16 %v542_v13, %v538_v12 }
 0x123   : > { %v696_v19 = vpack.c.bf16 %v544_v15, %v540_v14  ;;  %v572_v13 = vld [vmem:[%s2303_s24 + $0x758] sm:$0xff]  ;;  %v723_v15 = vld [vmem:[%s2323_s8 + $0x10] sm:$0xff] }
 0x124   : > { %v576_v14 = vld [vmem:[%s2303_s24 + $0x778] sm:$0xff] }
 0x126   : > { %1186 = vmatmul.mubr.bf16.gmra.mrb[56].mxu0 %v649_v24  ;;  %1475 = vmatmul.mubr.bf16.gmra.mrb[56].mxu1 %v651_v25  ;;  %v497_v24 = vld [vmem:[%s2303_s24 + $0x500] sm:$0xff] }
 0x127   : > { %1193 = vmatprep.mubr.bf16.mxu0 %v654_v26  ;;  %1482 = vmatprep.mubr.bf16.mxu1 %v656_v27  ;;  %v501_v25 = vld [vmem:[%s2303_s24 + $0x520] sm:$0xff]  ;;  %v499_v26 = vld [vmem:[%s2303_s24 + $0x510] sm:$0xff] }
 0x128   : > { %v503_v27 = vld [vmem:[%s2303_s24 + $0x530] sm:$0xff]  ;;  %v673_v32 = vpack.c.bf16 %v501_v25, %v497_v24  ;;  %v546_v24 = vld [vmem:[%s2303_s24 + $0x688] sm:$0xff] }
 0x129   : > { %v675_v33 = vpack.c.bf16 %v503_v27, %v499_v26  ;;  %v550_v25 = vld [vmem:[%s2303_s24 + $0x6a8] sm:$0xff]  ;;  %v548_v26 = vld [vmem:[%s2303_s24 + $0x698] sm:$0xff] }
 0x12a   : > { %v552_v27 = vld [vmem:[%s2303_s24 + $0x6b8] sm:$0xff]  ;;  %v698_v30 = vpack.c.bf16 %v550_v25, %v546_v24 }
 0x12b   : > { %v700_v31 = vpack.c.bf16 %v552_v27, %v548_v26  ;;  %v724_v24 = vld [vmem:[%s2323_s8 + $0x18] sm:$0xff]  ;;  %v712_v27 = vpack.c.bf16 %v576_v14, %v572_v13 }
 0x12e   : > { %1194 = vmatmul.mubr.bf16.gmra.mrb[60].mxu0 %v653_v36  ;;  %1483 = vmatmul.mubr.bf16.gmra.mrb[60].mxu1 %v655_v37  ;;  %v505_v36 = vld [vmem:[%s2303_s24 + $0x540] sm:$0xff] }
 0x12f   : > { %1201 = vmatprep.mubr.bf16.mxu0 %v658_v38  ;;  %1490 = vmatprep.mubr.bf16.mxu1 %v660_v39  ;;  %v509_v37 = vld [vmem:[%s2303_s24 + $0x560] sm:$0xff]  ;;  %v507_v38 = vld [vmem:[%s2303_s24 + $0x550] sm:$0xff] }
 0x130   : > { %v511_v39 = vld [vmem:[%s2303_s24 + $0x570] sm:$0xff]  ;;  %v677_v44 = vpack.c.bf16 %v509_v37, %v505_v36  ;;  %v554_v36 = vld [vmem:[%s2303_s24 + $0x6c8] sm:$0xff] }
 0x131   : > { %v679_v45 = vpack.c.bf16 %v511_v39, %v507_v38  ;;  %v558_v37 = vld [vmem:[%s2303_s24 + $0x6e8] sm:$0xff]  ;;  %v556_v38 = vld [vmem:[%s2303_s24 + $0x6d8] sm:$0xff] }
 0x132   : > { %v560_v39 = vld [vmem:[%s2303_s24 + $0x6f8] sm:$0xff]  ;;  %v702_v42 = vpack.c.bf16 %v558_v37, %v554_v36  ;;  %v578_v36 = vld [vmem:[%s2303_s24 + $0x788] sm:$0xff] }
 0x133   : > { %v704_v43 = vpack.c.bf16 %v560_v39, %v556_v38  ;;  %v582_v37 = vld [vmem:[%s2303_s24 + $0x7a8] sm:$0xff]  ;;  %v580_v39 = vld [vmem:[%s2303_s24 + $0x798] sm:$0xff] }
 0x136   : > { %1202 = vmatmul.mubr.bf16.gmra.mrb[64].mxu0 %v657_v48  ;;  %1491 = vmatmul.mubr.bf16.gmra.mrb[64].mxu1 %v659_v49  ;;  %v513_v48 = vld [vmem:[%s2303_s24 + $0x580] sm:$0xff] }
 0x137   : > { %1209 = vmatprep.mubr.bf16.mxu0 %v662_v50  ;;  %1498 = vmatprep.mubr.bf16.mxu1 %v664_v51  ;;  %v517_v49 = vld [vmem:[%s2303_s24 + $0x5a0] sm:$0xff]  ;;  %v515_v50 = vld [vmem:[%s2303_s24 + $0x590] sm:$0xff] }
 0x138   : > { %v519_v51 = vld [vmem:[%s2303_s24 + $0x5b0] sm:$0xff]  ;;  %v681_v56 = vpack.c.bf16 %v517_v49, %v513_v48  ;;  %v562_v48 = vld [vmem:[%s2303_s24 + $0x708] sm:$0xff] }
 0x139   : > { %v683_v57 = vpack.c.bf16 %v519_v51, %v515_v50  ;;  %v566_v49 = vld [vmem:[%s2303_s24 + $0x728] sm:$0xff]  ;;  %v564_v51 = vld [vmem:[%s2303_s24 + $0x718] sm:$0xff] }
 0x13a   : > { %v708_v1 = vpack.c.bf16 %v568_v52, %v564_v51 }
 0x13e   : > { %1210 = vmatmul.mubr.bf16.gmra.mrb[68].mxu0 %v661_v60  ;;  %1499 = vmatmul.mubr.bf16.gmra.mrb[68].mxu1 %v663_v61  ;;  %v521_v60 = vld [vmem:[%s2303_s24 + $0x5c0] sm:$0xff] }
 0x13f   : > { %1217 = vmatprep.mubr.bf16.mxu0 %v666_v62  ;;  %1506 = vmatprep.mubr.bf16.mxu1 %v668_v63  ;;  %v525_v61 = vld [vmem:[%s2303_s24 + $0x5e0] sm:$0xff]  ;;  %v523_v62 = vld [vmem:[%s2303_s24 + $0x5d0] sm:$0xff] }
 0x140   : > { %v527_v63 = vld [vmem:[%s2303_s24 + $0x5f0] sm:$0xff]  ;;  %v685_v4 = vpack.c.bf16 %v525_v61, %v521_v60  ;;  %v706_v61 = vpack.c.bf16 %v566_v49, %v562_v48  ;;  %v714_v49 = vpack.c.bf16 %v582_v37, %v578_v36 }
 0x141   : > { %v687_v5 = vpack.c.bf16 %v527_v63, %v523_v62  ;;  %v722_v62 = vld [vmem:[%s2323_s8 + $0x8] sm:$0xff] }
 0x146   : > { %1218 = vmatmul.mubr.bf16.gmra.mrb[72].mxu0 %v665_v8  ;;  %1507 = vmatmul.mubr.bf16.gmra.mrb[72].mxu1 %v667_v9  ;;  %v529_v8 = vld [vmem:[%s2303_s24 + $0x600] sm:$0xff] }
 0x147   : > { %1225 = vmatprep.mubr.bf16.mxu0 %v670_v10  ;;  %1514 = vmatprep.mubr.bf16.mxu1 %v672_v11  ;;  %v533_v9 = vld [vmem:[%s2303_s24 + $0x620] sm:$0xff]  ;;  %v531_v10 = vld [vmem:[%s2303_s24 + $0x610] sm:$0xff] }
 0x148   : > { %v535_v11 = vld [vmem:[%s2303_s24 + $0x630] sm:$0xff]  ;;  %v689_v16 = vpack.c.bf16 %v533_v9, %v529_v8 }
 0x149   : > { %v691_v17 = vpack.c.bf16 %v535_v11, %v531_v10  ;;  %v563_v8 = vld [vmem:[%s2303_s24 + $0x710] sm:$0xff]  ;;  %v570_v10 = vld [vmem:[%s2303_s24 + $0x748] sm:$0xff] }
 0x14a   : > { %v567_v9 = vld [vmem:[%s2303_s24 + $0x730] sm:$0xff]  ;;  %v574_v11 = vld [vmem:[%s2303_s24 + $0x768] sm:$0xff] }
 0x14e   : > { %1226 = vmatmul.mubr.bf16.gmra.mrb[76].mxu0 %v669_v20  ;;  %1515 = vmatmul.mubr.bf16.gmra.mrb[76].mxu1 %v671_v21  ;;  %v537_v20 = vld [vmem:[%s2303_s24 + $0x640] sm:$0xff] }
 0x14f   : > { %1233 = vmatprep.mubr.bf16.mxu0 %v674_v22  ;;  %1522 = vmatprep.mubr.bf16.mxu1 %v676_v23  ;;  %v541_v21 = vld [vmem:[%s2303_s24 + $0x660] sm:$0xff]  ;;  %v539_v22 = vld [vmem:[%s2303_s24 + $0x650] sm:$0xff] }
 0x150   : > { %v543_v23 = vld [vmem:[%s2303_s24 + $0x670] sm:$0xff]  ;;  %v693_v28 = vpack.c.bf16 %v541_v21, %v537_v20 }
 0x151   : > { %v695_v29 = vpack.c.bf16 %v543_v23, %v539_v22  ;;  %v707_v22 = vpack.c.bf16 %v567_v9, %v563_v8  ;;  %v710_v23 = vpack.c.bf16 %v574_v11, %v570_v10 }
 0x156   : > { %1234 = vmatmul.mubr.bf16.gmra.mrb[80].mxu0 %v673_v32  ;;  %1523 = vmatmul.mubr.bf16.gmra.mrb[80].mxu1 %v675_v33  ;;  %v545_v32 = vld [vmem:[%s2303_s24 + $0x680] sm:$0xff] }
 0x157   : > { %1241 = vmatprep.mubr.bf16.mxu0 %v678_v34  ;;  %1530 = vmatprep.mubr.bf16.mxu1 %v680_v35  ;;  %v549_v33 = vld [vmem:[%s2303_s24 + $0x6a0] sm:$0xff]  ;;  %v547_v34 = vld [vmem:[%s2303_s24 + $0x690] sm:$0xff] }
 0x158   : > { %v551_v35 = vld [vmem:[%s2303_s24 + $0x6b0] sm:$0xff]  ;;  %v697_v40 = vpack.c.bf16 %v549_v33, %v545_v32  ;;  %v569_v32 = vld [vmem:[%s2303_s24 + $0x740] sm:$0xff] }
 0x159   : > { %v699_v41 = vpack.c.bf16 %v551_v35, %v547_v34  ;;  %v573_v33 = vld [vmem:[%s2303_s24 + $0x760] sm:$0xff]  ;;  %v571_v34 = vld [vmem:[%s2303_s24 + $0x750] sm:$0xff] }
 0x15a   : > { %v575_v35 = vld [vmem:[%s2303_s24 + $0x770] sm:$0xff] }
 0x15b   : > { %v711_v48 = vpack.c.bf16 %v575_v35, %v571_v34 }
 0x15e   : > { %1242 = vmatmul.mubr.bf16.gmra.mrb[84].mxu0 %v677_v44  ;;  %1531 = vmatmul.mubr.bf16.gmra.mrb[84].mxu1 %v679_v45  ;;  %v553_v44 = vld [vmem:[%s2303_s24 + $0x6c0] sm:$0xff] }
 0x15f   : > { %1249 = vmatprep.mubr.bf16.mxu0 %v682_v46  ;;  %1538 = vmatprep.mubr.bf16.mxu1 %v684_v47  ;;  %v557_v45 = vld [vmem:[%s2303_s24 + $0x6e0] sm:$0xff]  ;;  %v555_v46 = vld [vmem:[%s2303_s24 + $0x6d0] sm:$0xff] }
 0x160   : > { %v559_v47 = vld [vmem:[%s2303_s24 + $0x6f0] sm:$0xff] }
 0x161   : > { %v703_v60 = vpack.c.bf16 %v559_v47, %v555_v46 }
 0x166   : > { %1250 = vmatmul.mubr.bf16.gmra.mrb[88].mxu0 %v681_v56  ;;  %1539 = vmatmul.mubr.bf16.gmra.mrb[88].mxu1 %v683_v57  ;;  %v701_v56 = vpack.c.bf16 %v557_v45, %v553_v44  ;;  %v709_v44 = vpack.c.bf16 %v573_v33, %v569_v32  ;;  %v730_v33 = vld [vmem:[%s2323_s8 + $0x48] sm:$0xff] }
 0x167   : > { %1257 = vmatprep.mubr.bf16.mxu0 %v686_v58  ;;  %1546 = vmatprep.mubr.bf16.mxu1 %v688_v59 }
 0x16e   : > { %1258 = vmatmul.mubr.bf16.gmra.mrb[92].mxu0 %v685_v4  ;;  %1547 = vmatmul.mubr.bf16.gmra.mrb[92].mxu1 %v687_v5 }
 0x16f   : > { %1265 = vmatprep.mubr.bf16.mxu0 %v690_v6  ;;  %1554 = vmatprep.mubr.bf16.mxu1 %v692_v7  ;;  %v561_v6 = vld [vmem:[%s2303_s24 + $0x700] sm:$0xff] }
 0x170   : > { %v565_v7 = vld [vmem:[%s2303_s24 + $0x720] sm:$0xff] }
 0x176   : > { %1266 = vmatmul.mubr.bf16.gmra.mrb[96].mxu0 %v689_v16  ;;  %1555 = vmatmul.mubr.bf16.gmra.mrb[96].mxu1 %v691_v17 }
 0x177   : > { %1273 = vmatprep.mubr.bf16.mxu0 %v694_v18  ;;  %1562 = vmatprep.mubr.bf16.mxu1 %v696_v19  ;;  %v705_v18 = vpack.c.bf16 %v565_v7, %v561_v6 }
 0x17e   : > { %1274 = vmatmul.mubr.bf16.gmra.mrb[100].mxu0 %v693_v28  ;;  %1563 = vmatmul.mubr.bf16.gmra.mrb[100].mxu1 %v695_v29 }
 0x17f   : > { %1281 = vmatprep.mubr.bf16.mxu0 %v698_v30  ;;  %1570 = vmatprep.mubr.bf16.mxu1 %v700_v31 }
 0x186   : > { %1282 = vmatmul.mubr.bf16.gmra.mrb[104].mxu0 %v697_v40  ;;  %1571 = vmatmul.mubr.bf16.gmra.mrb[104].mxu1 %v699_v41  ;;  %v584_v40 = vld [vmem:[%s2303_s24 + $0x7b8] sm:$0xff]  ;;  %v725_v41 = vld [vmem:[%s2323_s8 + $0x20] sm:$0xff] }
 0x187   : > { %1289 = vmatprep.mubr.bf16.mxu0 %v702_v42  ;;  %1578 = vmatprep.mubr.bf16.mxu1 %v704_v43 }
 0x189   : > { %v1075_v50 = vpop.f32.mrb[0].mxu0  ;;  %v1364_v54 = vpop.f32.mrb[0].mxu1 }
 0x18a   : > { %v1077_v55 = vpop.f32.mrb[1].mxu0  ;;  %v1365_v57 = vadd.f32 %v1364_v54, %v1075_v50  ;;  %v1366_v58 = vpop.f32.mrb[1].mxu1  ;;  %v726_v50 = vld [vmem:[%s2323_s8 + $0x28] sm:$0xff] }
 0x18b   : > { %v1078_v59 = vpop.f32.mrb[2].mxu0  ;;  %v1367_v63 = vpop.f32.mrb[2].mxu1  ;;  %v577_v58 = vld [vmem:[%s2303_s24 + $0x780] sm:$0xff] }
 0x18c   : > { %v1080_v0 = vpop.f32.mrb[3].mxu0  ;;  %v1619_v2 = vadd.f32 %v1365_v57, %v721_v53  ;;  %v1368_v3 = vadd.f32 %v1367_v63, %v1078_v59  ;;  %v1369_v4 = vpop.f32.mrb[3].mxu1  ;;  %v716_v53 = vpack.c.bf16 %v584_v40, %v580_v39  ;;  %v581_v59 = vld [vmem:[%s2303_s24 + $0x7a0] sm:$0xff]  ;;  %v590_v63 = vld [vmem:[%s2303_s24 + $0x7e8] sm:$0xff] }
 0x18d   : > { %v713_v6 = vpack.c.bf16 %v581_v59, %v577_v58 }
 0x18e   : > { %1290 = vmatmul.mubr.bf16.gmra.mrb[108].mxu0 %v701_v56  ;;  %1683 = vst [vmem:[%s2323_s8] sm:$0xff] %v1619_v2  ;;  %v1620_v5 = vadd.f32 %v1368_v3, %v722_v62  ;;  %1579 = vmatmul.mubr.bf16.gmra.mrb[108].mxu1 %v703_v60  ;;  %v579_v60 = vld [vmem:[%s2303_s24 + $0x790] sm:$0xff]  ;;  %v586_v62 = vld [vmem:[%s2303_s24 + $0x7c8] sm:$0xff]  ;;  %v592_v2 = vld [vmem:[%s2303_s24 + $0x7f8] sm:$0xff] }
 0x18f   : > { %1297 = vmatprep.mubr.bf16.mxu0 %v706_v61  ;;  %1586 = vmatprep.mubr.bf16.mxu1 %v708_v1  ;;  %v583_v61 = vld [vmem:[%s2303_s24 + $0x7b0] sm:$0xff]  ;;  %v588_v1 = vld [vmem:[%s2303_s24 + $0x7d8] sm:$0xff]  ;;  %v718_v11 = vpack.c.bf16 %v590_v63, %v586_v62 }
 0x190   : > { %1684 = vst [vmem:[%s2323_s8 + $0x8] sm:$0xff] %v1620_v5  ;;  %v727_v3 = vld [vmem:[%s2323_s8 + $0x30] sm:$0xff]  ;;  %v715_v10 = vpack.c.bf16 %v583_v61, %v579_v60  ;;  %v734_v61 = vld [vmem:[%s2323_s8 + $0x68] sm:$0xff] }
 0x191   : > { %v1083_v12 = vpop.f32.mrb[4].mxu0  ;;  %v1372_v16 = vpop.f32.mrb[4].mxu1 }
 0x192   : > { %v1085_v17 = vpop.f32.mrb[5].mxu0  ;;  %v1373_v19 = vadd.f32 %v1372_v16, %v1083_v12  ;;  %v1374_v20 = vpop.f32.mrb[5].mxu1  ;;  %v728_v12 = vld [vmem:[%s2323_s8 + $0x38] sm:$0xff] }
 0x193   : > { %v1086_v21 = vpop.f32.mrb[6].mxu0  ;;  %v1375_v25 = vpop.f32.mrb[6].mxu1  ;;  %v585_v20 = vld [vmem:[%s2303_s24 + $0x7c0] sm:$0xff] }
 0x194   : > { %v1088_v26 = vpop.f32.mrb[7].mxu0  ;;  %v1621_v28 = vadd.f32 %v1373_v19, %v723_v15  ;;  %v1376_v29 = vadd.f32 %v1375_v25, %v1086_v21  ;;  %v1377_v30 = vpop.f32.mrb[7].mxu1  ;;  %v720_v15 = vpack.c.bf16 %v592_v2, %v588_v1  ;;  %v589_v21 = vld [vmem:[%s2303_s24 + $0x7e0] sm:$0xff] }
 0x195   : > { %v729_v25 = vld [vmem:[%s2323_s8 + $0x40] sm:$0xff] }
 0x196   : > { %1298 = vmatmul.mubr.bf16.gmra.mrb[112].mxu0 %v705_v18  ;;  %1685 = vst [vmem:[%s2323_s8 + $0x10] sm:$0xff] %v1621_v28  ;;  %v1622_v31 = vadd.f32 %v1376_v29, %v724_v24  ;;  %1587 = vmatmul.mubr.bf16.gmra.mrb[112].mxu1 %v707_v22  ;;  %v587_v22 = vld [vmem:[%s2303_s24 + $0x7d0] sm:$0xff]  ;;  %v717_v28 = vpack.c.bf16 %v589_v21, %v585_v20 }
 0x197   : > { %1305 = vmatprep.mubr.bf16.mxu0 %v710_v23  ;;  %1594 = vmatprep.mubr.bf16.mxu1 %v712_v27  ;;  %v591_v23 = vld [vmem:[%s2303_s24 + $0x7f0] sm:$0xff] }
 0x198   : > { %1686 = vst [vmem:[%s2323_s8 + $0x18] sm:$0xff] %v1622_v31  ;;  %v719_v32 = vpack.c.bf16 %v591_v23, %v587_v22 }
 0x199   : > { %v1091_v38 = vpop.f32.mrb[8].mxu0  ;;  %v1380_v42 = vpop.f32.mrb[8].mxu1 }
 0x19a   : > { %v1093_v43 = vpop.f32.mrb[9].mxu0  ;;  %v1381_v45 = vadd.f32 %v1380_v42, %v1091_v38  ;;  %v1382_v46 = vpop.f32.mrb[9].mxu1 }
 0x19b   : > { %v1094_v47 = vpop.f32.mrb[10].mxu0  ;;  %v1383_v51 = vpop.f32.mrb[10].mxu1 }
 0x19c   : > { %v1096_v52 = vpop.f32.mrb[11].mxu0  ;;  %v1623_v54 = vadd.f32 %v1381_v45, %v725_v41  ;;  %v1384_v55 = vadd.f32 %v1383_v51, %v1094_v47  ;;  %v1385_v56 = vpop.f32.mrb[11].mxu1  ;;  %v731_v41 = vld [vmem:[%s2323_s8 + $0x50] sm:$0xff]  ;;  %v732_v47 = vld [vmem:[%s2323_s8 + $0x58] sm:$0xff] }
 0x19e   : > { %1306 = vmatmul.mubr.bf16.gmra.mrb[116].mxu0 %v709_v44  ;;  %1687 = vst [vmem:[%s2323_s8 + $0x20] sm:$0xff] %v1623_v54  ;;  %v1624_v57 = vadd.f32 %v1384_v55, %v726_v50  ;;  %1595 = vmatmul.mubr.bf16.gmra.mrb[116].mxu1 %v711_v48  ;;  %v733_v55 = vld [vmem:[%s2323_s8 + $0x60] sm:$0xff] }
 0x19f   : > { %1313 = vmatprep.mubr.bf16.mxu0 %v714_v49  ;;  %1602 = vmatprep.mubr.bf16.mxu1 %v716_v53 }
 0x1a0   : > { %1688 = vst [vmem:[%s2323_s8 + $0x28] sm:$0xff] %v1624_v57 }
 0x1a1   : > { %v1099_v0 = vpop.f32.mrb[12].mxu0  ;;  %v1388_v4 = vpop.f32.mrb[12].mxu1 }
 0x1a2   : > { %v1101_v5 = vpop.f32.mrb[13].mxu0  ;;  %v1389_v7 = vadd.f32 %v1388_v4, %v1099_v0  ;;  %v1390_v8 = vpop.f32.mrb[13].mxu1 }
 0x1a3   : > { %v1102_v9 = vpop.f32.mrb[14].mxu0  ;;  %v1391_v13 = vpop.f32.mrb[14].mxu1  ;;  %v735_v5 = vld [vmem:[%s2323_s8 + $0x70] sm:$0xff] }
 0x1a4   : > { %v1104_v14 = vpop.f32.mrb[15].mxu0  ;;  %v1625_v16 = vadd.f32 %v1389_v7, %v727_v3  ;;  %v1392_v17 = vadd.f32 %v1391_v13, %v1102_v9  ;;  %v1393_v18 = vpop.f32.mrb[15].mxu1 }
 0x1a6   : > { %1314 = vmatmul.mubr.bf16.gmra.mrb[120].mxu0 %v713_v6  ;;  %1689 = vst [vmem:[%s2323_s8 + $0x30] sm:$0xff] %v1625_v16  ;;  %v1626_v19 = vadd.f32 %v1392_v17, %v728_v12  ;;  %1603 = vmatmul.mubr.bf16.gmra.mrb[120].mxu1 %v715_v10 }
 0x1a7   : > { %1321 = vmatprep.mubr.bf16.mxu0 %v718_v11  ;;  %1610 = vmatprep.mubr.bf16.mxu1 %v720_v15  ;;  %v736_v11 = vld [vmem:[%s2323_s8 + $0x78] sm:$0xff] }
 0x1a8   : > { %1690 = vst [vmem:[%s2323_s8 + $0x38] sm:$0xff] %v1626_v19  ;;  %v737_v19 = vld [vmem:[%s2323_s8 + $0x80] sm:$0xff] }
 0x1a9   : > { %v1107_v24 = vpop.f32.mrb[16].mxu0  ;;  %v1396_v26 = vpop.f32.mrb[16].mxu1 }
 0x1aa   : > { %v1109_v27 = vpop.f32.mrb[17].mxu0  ;;  %v1397_v29 = vadd.f32 %v1396_v26, %v1107_v24  ;;  %v1398_v30 = vpop.f32.mrb[17].mxu1 }
 0x1ab   : > { %v1110_v31 = vpop.f32.mrb[18].mxu0  ;;  %v1399_v34 = vpop.f32.mrb[18].mxu1 }
 0x1ac   : > { %v1112_v35 = vpop.f32.mrb[19].mxu0  ;;  %v1627_v36 = vadd.f32 %v1397_v29, %v729_v25  ;;  %v1400_v37 = vadd.f32 %v1399_v34, %v1110_v31  ;;  %v1401_v38 = vpop.f32.mrb[19].mxu1  ;;  %v738_v25 = vld [vmem:[%s2323_s8 + $0x88] sm:$0xff] }
 0x1ae   : > { %1322 = vmatmul.mubr.bf16.gmra.mrb[124].mxu0 %v717_v28  ;;  %1691 = vst [vmem:[%s2323_s8 + $0x40] sm:$0xff] %v1627_v36  ;;  %v1628_v39 = vadd.f32 %v1400_v37, %v730_v33  ;;  %1611 = vmatmul.mubr.bf16.gmra.mrb[124].mxu1 %v719_v32  ;;  %v739_v33 = vld [vmem:[%s2323_s8 + $0x90] sm:$0xff] }
 0x1b0   : > { %1692 = vst [vmem:[%s2323_s8 + $0x48] sm:$0xff] %v1628_v39  ;;  %v740_v39 = vld [vmem:[%s2323_s8 + $0x98] sm:$0xff] }
 0x1b1   : > { %v1115_v40 = vpop.f32.mrb[20].mxu0  ;;  %v1404_v42 = vpop.f32.mrb[20].mxu1 }
 0x1b2   : > { %v1117_v43 = vpop.f32.mrb[21].mxu0  ;;  %v1405_v44 = vadd.f32 %v1404_v42, %v1115_v40  ;;  %v1406_v45 = vpop.f32.mrb[21].mxu1 }
 0x1b3   : > { %v1118_v46 = vpop.f32.mrb[22].mxu0  ;;  %v1407_v48 = vpop.f32.mrb[22].mxu1 }
 0x1b4   : > { %v1120_v49 = vpop.f32.mrb[23].mxu0  ;;  %v1629_v50 = vadd.f32 %v1405_v44, %v731_v41  ;;  %v1408_v51 = vadd.f32 %v1407_v48, %v1118_v46  ;;  %v1409_v52 = vpop.f32.mrb[23].mxu1 }
 0x1b6   : > { %1693 = vst [vmem:[%s2323_s8 + $0x50] sm:$0xff] %v1629_v50  ;;  %v1630_v53 = vadd.f32 %v1408_v51, %v732_v47  ;;  %v741_v47 = vld [vmem:[%s2323_s8 + $0xa0] sm:$0xff] }
 0x1b8   : > { %1694 = vst [vmem:[%s2323_s8 + $0x58] sm:$0xff] %v1630_v53  ;;  %v742_v53 = vld [vmem:[%s2323_s8 + $0xa8] sm:$0xff] }
 0x1b9   : > { %v1123_v54 = vpop.f32.mrb[24].mxu0  ;;  %v1412_v56 = vpop.f32.mrb[24].mxu1 }
 0x1ba   : > { %v1125_v57 = vpop.f32.mrb[25].mxu0  ;;  %v1413_v58 = vadd.f32 %v1412_v56, %v1123_v54  ;;  %v1414_v59 = vpop.f32.mrb[25].mxu1 }
 0x1bb   : > { %v1126_v60 = vpop.f32.mrb[26].mxu0  ;;  %v1415_v62 = vpop.f32.mrb[26].mxu1 }
 0x1bc   : > { %v1128_v63 = vpop.f32.mrb[27].mxu0  ;;  %v1631_v0 = vadd.f32 %v1413_v58, %v733_v55  ;;  %v1416_v1 = vadd.f32 %v1415_v62, %v1126_v60  ;;  %v1417_v2 = vpop.f32.mrb[27].mxu1 }
 0x1be   : > { %1695 = vst [vmem:[%s2323_s8 + $0x60] sm:$0xff] %v1631_v0  ;;  %v1632_v3 = vadd.f32 %v1416_v1, %v734_v61  ;;  %v743_v61 = vld [vmem:[%s2323_s8 + $0xb0] sm:$0xff] }
 0x1c0   : > { %1696 = vst [vmem:[%s2323_s8 + $0x68] sm:$0xff] %v1632_v3  ;;  %v744_v3 = vld [vmem:[%s2323_s8 + $0xb8] sm:$0xff] }
 0x1c1   : > { %v1131_v4 = vpop.f32.mrb[28].mxu0  ;;  %v1420_v6 = vpop.f32.mrb[28].mxu1 }
 0x1c2   : > { %v1133_v7 = vpop.f32.mrb[29].mxu0  ;;  %v1421_v8 = vadd.f32 %v1420_v6, %v1131_v4  ;;  %v1422_v9 = vpop.f32.mrb[29].mxu1 }
 0x1c3   : > { %v1134_v10 = vpop.f32.mrb[30].mxu0  ;;  %v1423_v12 = vpop.f32.mrb[30].mxu1 }
 0x1c4   : > { %v1136_v13 = vpop.f32.mrb[31].mxu0  ;;  %v1633_v14 = vadd.f32 %v1421_v8, %v735_v5  ;;  %v1424_v15 = vadd.f32 %v1423_v12, %v1134_v10  ;;  %v1425_v16 = vpop.f32.mrb[31].mxu1 }
 0x1c6   : > { %1697 = vst [vmem:[%s2323_s8 + $0x70] sm:$0xff] %v1633_v14  ;;  %v1634_v17 = vadd.f32 %v1424_v15, %v736_v11  ;;  %v745_v11 = vld [vmem:[%s2323_s8 + $0xc0] sm:$0xff] }
 0x1c8   : > { %1698 = vst [vmem:[%s2323_s8 + $0x78] sm:$0xff] %v1634_v17  ;;  %v746_v17 = vld [vmem:[%s2323_s8 + $0xc8] sm:$0xff] }
 0x1c9   : > { %v1139_v18 = vpop.f32.mrb[32].mxu0  ;;  %v1428_v20 = vpop.f32.mrb[32].mxu1 }
 0x1ca   : > { %v1141_v21 = vpop.f32.mrb[33].mxu0  ;;  %v1429_v22 = vadd.f32 %v1428_v20, %v1139_v18  ;;  %v1430_v23 = vpop.f32.mrb[33].mxu1 }
 0x1cb   : > { %v1142_v24 = vpop.f32.mrb[34].mxu0  ;;  %v1431_v26 = vpop.f32.mrb[34].mxu1 }
 0x1cc   : > { %v1144_v27 = vpop.f32.mrb[35].mxu0  ;;  %v1635_v28 = vadd.f32 %v1429_v22, %v737_v19  ;;  %v1432_v29 = vadd.f32 %v1431_v26, %v1142_v24  ;;  %v1433_v30 = vpop.f32.mrb[35].mxu1 }
 0x1ce   : > { %1699 = vst [vmem:[%s2323_s8 + $0x80] sm:$0xff] %v1635_v28  ;;  %v1636_v31 = vadd.f32 %v1432_v29, %v738_v25  ;;  %v747_v25 = vld [vmem:[%s2323_s8 + $0xd0] sm:$0xff] }
 0x1d0   : > { %1700 = vst [vmem:[%s2323_s8 + $0x88] sm:$0xff] %v1636_v31  ;;  %v748_v31 = vld [vmem:[%s2323_s8 + $0xd8] sm:$0xff] }
 0x1d1   : > { %v1147_v32 = vpop.f32.mrb[36].mxu0  ;;  %v1436_v34 = vpop.f32.mrb[36].mxu1 }
 0x1d2   : > { %v1149_v35 = vpop.f32.mrb[37].mxu0  ;;  %v1437_v36 = vadd.f32 %v1436_v34, %v1147_v32  ;;  %v1438_v37 = vpop.f32.mrb[37].mxu1 }
 0x1d3   : > { %v1150_v38 = vpop.f32.mrb[38].mxu0  ;;  %v1439_v40 = vpop.f32.mrb[38].mxu1 }
 0x1d4   : > { %v1152_v41 = vpop.f32.mrb[39].mxu0  ;;  %v1637_v42 = vadd.f32 %v1437_v36, %v739_v33  ;;  %v1440_v43 = vadd.f32 %v1439_v40, %v1150_v38  ;;  %v1441_v44 = vpop.f32.mrb[39].mxu1 }
 0x1d6   : > { %1701 = vst [vmem:[%s2323_s8 + $0x90] sm:$0xff] %v1637_v42  ;;  %v1638_v45 = vadd.f32 %v1440_v43, %v740_v39  ;;  %v749_v39 = vld [vmem:[%s2323_s8 + $0xe0] sm:$0xff] }
 0x1d8   : > { %1702 = vst [vmem:[%s2323_s8 + $0x98] sm:$0xff] %v1638_v45  ;;  %v750_v45 = vld [vmem:[%s2323_s8 + $0xe8] sm:$0xff] }
 0x1d9   : > { %v1155_v46 = vpop.f32.mrb[40].mxu0  ;;  %v1444_v48 = vpop.f32.mrb[40].mxu1 }
 0x1da   : > { %v1157_v49 = vpop.f32.mrb[41].mxu0  ;;  %v1445_v50 = vadd.f32 %v1444_v48, %v1155_v46  ;;  %v1446_v51 = vpop.f32.mrb[41].mxu1 }
 0x1db   : > { %v1158_v52 = vpop.f32.mrb[42].mxu0  ;;  %v1447_v54 = vpop.f32.mrb[42].mxu1 }
 0x1dc   : > { %v1160_v55 = vpop.f32.mrb[43].mxu0  ;;  %v1639_v56 = vadd.f32 %v1445_v50, %v741_v47  ;;  %v1448_v57 = vadd.f32 %v1447_v54, %v1158_v52  ;;  %v1449_v58 = vpop.f32.mrb[43].mxu1 }
 0x1de   : > { %1703 = vst [vmem:[%s2323_s8 + $0xa0] sm:$0xff] %v1639_v56  ;;  %v1640_v59 = vadd.f32 %v1448_v57, %v742_v53  ;;  %v751_v53 = vld [vmem:[%s2323_s8 + $0xf0] sm:$0xff] }
 0x1e0   : > { %1704 = vst [vmem:[%s2323_s8 + $0xa8] sm:$0xff] %v1640_v59  ;;  %v752_v59 = vld [vmem:[%s2323_s8 + $0xf8] sm:$0xff] }
 0x1e1   : > { %v1163_v60 = vpop.f32.mrb[44].mxu0  ;;  %v1452_v62 = vpop.f32.mrb[44].mxu1 }
 0x1e2   : > { %v1165_v63 = vpop.f32.mrb[45].mxu0  ;;  %v1453_v0 = vadd.f32 %v1452_v62, %v1163_v60  ;;  %v1454_v1 = vpop.f32.mrb[45].mxu1 }
 0x1e3   : > { %v1166_v2 = vpop.f32.mrb[46].mxu0  ;;  %v1455_v4 = vpop.f32.mrb[46].mxu1 }
 0x1e4   : > { %v1168_v5 = vpop.f32.mrb[47].mxu0  ;;  %v1641_v6 = vadd.f32 %v1453_v0, %v743_v61  ;;  %v1456_v7 = vadd.f32 %v1455_v4, %v1166_v2  ;;  %v1457_v8 = vpop.f32.mrb[47].mxu1 }
 0x1e6   : > { %1705 = vst [vmem:[%s2323_s8 + $0xb0] sm:$0xff] %v1641_v6  ;;  %v1642_v9 = vadd.f32 %v1456_v7, %v744_v3  ;;  %v753_v3 = vld [vmem:[%s2323_s8 + $0x100] sm:$0xff] }
 0x1e8   : > { %1706 = vst [vmem:[%s2323_s8 + $0xb8] sm:$0xff] %v1642_v9  ;;  %v754_v9 = vld [vmem:[%s2323_s8 + $0x108] sm:$0xff] }
 0x1e9   : > { %v1171_v10 = vpop.f32.mrb[48].mxu0  ;;  %v1460_v12 = vpop.f32.mrb[48].mxu1 }
 0x1ea   : > { %v1173_v13 = vpop.f32.mrb[49].mxu0  ;;  %v1461_v14 = vadd.f32 %v1460_v12, %v1171_v10  ;;  %v1462_v15 = vpop.f32.mrb[49].mxu1 }
 0x1eb   : > { %v1174_v16 = vpop.f32.mrb[50].mxu0  ;;  %v1463_v18 = vpop.f32.mrb[50].mxu1 }
 0x1ec   : > { %v1176_v19 = vpop.f32.mrb[51].mxu0  ;;  %v1643_v20 = vadd.f32 %v1461_v14, %v745_v11  ;;  %v1464_v21 = vadd.f32 %v1463_v18, %v1174_v16  ;;  %v1465_v22 = vpop.f32.mrb[51].mxu1 }
 0x1ee   : > { %1707 = vst [vmem:[%s2323_s8 + $0xc0] sm:$0xff] %v1643_v20  ;;  %v1644_v23 = vadd.f32 %v1464_v21, %v746_v17  ;;  %v755_v17 = vld [vmem:[%s2323_s8 + $0x110] sm:$0xff] }
 0x1f0   : > { %1708 = vst [vmem:[%s2323_s8 + $0xc8] sm:$0xff] %v1644_v23  ;;  %v756_v23 = vld [vmem:[%s2323_s8 + $0x118] sm:$0xff] }
 0x1f1   : > { %v1179_v24 = vpop.f32.mrb[52].mxu0  ;;  %v1468_v26 = vpop.f32.mrb[52].mxu1 }
 0x1f2   : > { %v1181_v27 = vpop.f32.mrb[53].mxu0  ;;  %v1469_v28 = vadd.f32 %v1468_v26, %v1179_v24  ;;  %v1470_v29 = vpop.f32.mrb[53].mxu1 }
 0x1f3   : > { %v1182_v30 = vpop.f32.mrb[54].mxu0  ;;  %v1471_v32 = vpop.f32.mrb[54].mxu1 }
 0x1f4   : > { %v1184_v33 = vpop.f32.mrb[55].mxu0  ;;  %v1645_v34 = vadd.f32 %v1469_v28, %v747_v25  ;;  %v1472_v35 = vadd.f32 %v1471_v32, %v1182_v30  ;;  %v1473_v36 = vpop.f32.mrb[55].mxu1 }
 0x1f6   : > { %1709 = vst [vmem:[%s2323_s8 + $0xd0] sm:$0xff] %v1645_v34  ;;  %v1646_v37 = vadd.f32 %v1472_v35, %v748_v31  ;;  %v757_v31 = vld [vmem:[%s2323_s8 + $0x120] sm:$0xff] }
 0x1f8   : > { %1710 = vst [vmem:[%s2323_s8 + $0xd8] sm:$0xff] %v1646_v37  ;;  %v758_v37 = vld [vmem:[%s2323_s8 + $0x128] sm:$0xff] }
 0x1f9   : > { %v1187_v38 = vpop.f32.mrb[56].mxu0  ;;  %v1476_v40 = vpop.f32.mrb[56].mxu1 }
 0x1fa   : > { %v1189_v41 = vpop.f32.mrb[57].mxu0  ;;  %v1477_v42 = vadd.f32 %v1476_v40, %v1187_v38  ;;  %v1478_v43 = vpop.f32.mrb[57].mxu1 }
 0x1fb   : > { %v1190_v44 = vpop.f32.mrb[58].mxu0  ;;  %v1479_v46 = vpop.f32.mrb[58].mxu1 }
 0x1fc   : > { %v1192_v47 = vpop.f32.mrb[59].mxu0  ;;  %v1647_v48 = vadd.f32 %v1477_v42, %v749_v39  ;;  %v1480_v49 = vadd.f32 %v1479_v46, %v1190_v44  ;;  %v1481_v50 = vpop.f32.mrb[59].mxu1 }
 0x1fe   : > { %1711 = vst [vmem:[%s2323_s8 + $0xe0] sm:$0xff] %v1647_v48  ;;  %v1648_v51 = vadd.f32 %v1480_v49, %v750_v45  ;;  %v759_v45 = vld [vmem:[%s2323_s8 + $0x130] sm:$0xff] }
 0x200   : > { %1712 = vst [vmem:[%s2323_s8 + $0xe8] sm:$0xff] %v1648_v51  ;;  %v760_v51 = vld [vmem:[%s2323_s8 + $0x138] sm:$0xff] }
 0x201   : > { %v1195_v52 = vpop.f32.mrb[60].mxu0  ;;  %v1484_v54 = vpop.f32.mrb[60].mxu1 }
 0x202   : > { %v1197_v55 = vpop.f32.mrb[61].mxu0  ;;  %v1485_v56 = vadd.f32 %v1484_v54, %v1195_v52  ;;  %v1486_v57 = vpop.f32.mrb[61].mxu1 }
 0x203   : > { %v1198_v58 = vpop.f32.mrb[62].mxu0  ;;  %v1487_v60 = vpop.f32.mrb[62].mxu1 }
 0x204   : > { %v1200_v61 = vpop.f32.mrb[63].mxu0  ;;  %v1649_v62 = vadd.f32 %v1485_v56, %v751_v53  ;;  %v1488_v63 = vadd.f32 %v1487_v60, %v1198_v58  ;;  %v1489_v0 = vpop.f32.mrb[63].mxu1 }
 0x206   : > { %1713 = vst [vmem:[%s2323_s8 + $0xf0] sm:$0xff] %v1649_v62  ;;  %v1650_v1 = vadd.f32 %v1488_v63, %v752_v59  ;;  %v761_v59 = vld [vmem:[%s2323_s8 + $0x140] sm:$0xff] }
 0x208   : > { %1714 = vst [vmem:[%s2323_s8 + $0xf8] sm:$0xff] %v1650_v1  ;;  %v762_v1 = vld [vmem:[%s2323_s8 + $0x148] sm:$0xff] }
 0x209   : > { %v1203_v2 = vpop.f32.mrb[64].mxu0  ;;  %v1492_v4 = vpop.f32.mrb[64].mxu1 }
 0x20a   : > { %v1205_v5 = vpop.f32.mrb[65].mxu0  ;;  %v1493_v6 = vadd.f32 %v1492_v4, %v1203_v2  ;;  %v1494_v7 = vpop.f32.mrb[65].mxu1 }
 0x20b   : > { %v1206_v8 = vpop.f32.mrb[66].mxu0  ;;  %v1495_v10 = vpop.f32.mrb[66].mxu1 }
 0x20c   : > { %v1208_v11 = vpop.f32.mrb[67].mxu0  ;;  %v1651_v12 = vadd.f32 %v1493_v6, %v753_v3  ;;  %v1496_v13 = vadd.f32 %v1495_v10, %v1206_v8  ;;  %v1497_v14 = vpop.f32.mrb[67].mxu1 }
 0x20e   : > { %1715 = vst [vmem:[%s2323_s8 + $0x100] sm:$0xff] %v1651_v12  ;;  %v1652_v15 = vadd.f32 %v1496_v13, %v754_v9  ;;  %v763_v9 = vld [vmem:[%s2323_s8 + $0x150] sm:$0xff] }
 0x210   : > { %1716 = vst [vmem:[%s2323_s8 + $0x108] sm:$0xff] %v1652_v15  ;;  %v764_v15 = vld [vmem:[%s2323_s8 + $0x158] sm:$0xff] }
 0x211   : > { %v1211_v16 = vpop.f32.mrb[68].mxu0  ;;  %v1500_v18 = vpop.f32.mrb[68].mxu1 }
 0x212   : > { %v1213_v19 = vpop.f32.mrb[69].mxu0  ;;  %v1501_v20 = vadd.f32 %v1500_v18, %v1211_v16  ;;  %v1502_v21 = vpop.f32.mrb[69].mxu1 }
 0x213   : > { %v1214_v22 = vpop.f32.mrb[70].mxu0  ;;  %v1503_v24 = vpop.f32.mrb[70].mxu1 }
 0x214   : > { %v1216_v25 = vpop.f32.mrb[71].mxu0  ;;  %v1653_v26 = vadd.f32 %v1501_v20, %v755_v17  ;;  %v1504_v27 = vadd.f32 %v1503_v24, %v1214_v22  ;;  %v1505_v28 = vpop.f32.mrb[71].mxu1 }
 0x216   : > { %1717 = vst [vmem:[%s2323_s8 + $0x110] sm:$0xff] %v1653_v26  ;;  %v1654_v29 = vadd.f32 %v1504_v27, %v756_v23  ;;  %v765_v23 = vld [vmem:[%s2323_s8 + $0x160] sm:$0xff] }
 0x218   : > { %1718 = vst [vmem:[%s2323_s8 + $0x118] sm:$0xff] %v1654_v29  ;;  %v766_v29 = vld [vmem:[%s2323_s8 + $0x168] sm:$0xff] }
 0x219   : > { %v1219_v30 = vpop.f32.mrb[72].mxu0  ;;  %v1508_v32 = vpop.f32.mrb[72].mxu1 }
 0x21a   : > { %v1221_v33 = vpop.f32.mrb[73].mxu0  ;;  %v1509_v34 = vadd.f32 %v1508_v32, %v1219_v30  ;;  %v1510_v35 = vpop.f32.mrb[73].mxu1 }
 0x21b   : > { %v1222_v36 = vpop.f32.mrb[74].mxu0  ;;  %v1511_v38 = vpop.f32.mrb[74].mxu1 }
 0x21c   : > { %v1224_v39 = vpop.f32.mrb[75].mxu0  ;;  %v1655_v40 = vadd.f32 %v1509_v34, %v757_v31  ;;  %v1512_v41 = vadd.f32 %v1511_v38, %v1222_v36  ;;  %v1513_v42 = vpop.f32.mrb[75].mxu1 }
 0x21e   : > { %1719 = vst [vmem:[%s2323_s8 + $0x120] sm:$0xff] %v1655_v40  ;;  %v1656_v43 = vadd.f32 %v1512_v41, %v758_v37  ;;  %v767_v37 = vld [vmem:[%s2323_s8 + $0x170] sm:$0xff] }
 0x220   : > { %1720 = vst [vmem:[%s2323_s8 + $0x128] sm:$0xff] %v1656_v43  ;;  %v768_v43 = vld [vmem:[%s2323_s8 + $0x178] sm:$0xff] }
 0x221   : > { %v1227_v44 = vpop.f32.mrb[76].mxu0  ;;  %v1516_v46 = vpop.f32.mrb[76].mxu1 }
 0x222   : > { %v1229_v47 = vpop.f32.mrb[77].mxu0  ;;  %v1517_v48 = vadd.f32 %v1516_v46, %v1227_v44  ;;  %v1518_v49 = vpop.f32.mrb[77].mxu1 }
 0x223   : > { %v1230_v50 = vpop.f32.mrb[78].mxu0  ;;  %v1519_v52 = vpop.f32.mrb[78].mxu1 }
 0x224   : > { %v1232_v53 = vpop.f32.mrb[79].mxu0  ;;  %v1657_v54 = vadd.f32 %v1517_v48, %v759_v45  ;;  %v1520_v55 = vadd.f32 %v1519_v52, %v1230_v50  ;;  %v1521_v56 = vpop.f32.mrb[79].mxu1 }
 0x226   : > { %1721 = vst [vmem:[%s2323_s8 + $0x130] sm:$0xff] %v1657_v54  ;;  %v1658_v57 = vadd.f32 %v1520_v55, %v760_v51  ;;  %v769_v51 = vld [vmem:[%s2323_s8 + $0x180] sm:$0xff] }
 0x228   : > { %1722 = vst [vmem:[%s2323_s8 + $0x138] sm:$0xff] %v1658_v57  ;;  %v770_v57 = vld [vmem:[%s2323_s8 + $0x188] sm:$0xff] }
 0x229   : > { %v1235_v58 = vpop.f32.mrb[80].mxu0  ;;  %v1524_v60 = vpop.f32.mrb[80].mxu1 }
 0x22a   : > { %v1237_v61 = vpop.f32.mrb[81].mxu0  ;;  %v1525_v62 = vadd.f32 %v1524_v60, %v1235_v58  ;;  %v1526_v63 = vpop.f32.mrb[81].mxu1 }
 0x22b   : > { %v1238_v0 = vpop.f32.mrb[82].mxu0  ;;  %v1527_v2 = vpop.f32.mrb[82].mxu1 }
 0x22c   : > { %v1240_v3 = vpop.f32.mrb[83].mxu0  ;;  %v1659_v4 = vadd.f32 %v1525_v62, %v761_v59  ;;  %v1528_v5 = vadd.f32 %v1527_v2, %v1238_v0  ;;  %v1529_v6 = vpop.f32.mrb[83].mxu1 }
 0x22e   : > { %1723 = vst [vmem:[%s2323_s8 + $0x140] sm:$0xff] %v1659_v4  ;;  %v1660_v7 = vadd.f32 %v1528_v5, %v762_v1  ;;  %v771_v1 = vld [vmem:[%s2323_s8 + $0x190] sm:$0xff] }
 0x230   : > { %1724 = vst [vmem:[%s2323_s8 + $0x148] sm:$0xff] %v1660_v7  ;;  %v772_v7 = vld [vmem:[%s2323_s8 + $0x198] sm:$0xff] }
 0x231   : > { %v1243_v8 = vpop.f32.mrb[84].mxu0  ;;  %v1532_v10 = vpop.f32.mrb[84].mxu1 }
 0x232   : > { %v1245_v11 = vpop.f32.mrb[85].mxu0  ;;  %v1533_v12 = vadd.f32 %v1532_v10, %v1243_v8  ;;  %v1534_v13 = vpop.f32.mrb[85].mxu1 }
 0x233   : > { %v1246_v14 = vpop.f32.mrb[86].mxu0  ;;  %v1535_v16 = vpop.f32.mrb[86].mxu1 }
 0x234   : > { %v1248_v17 = vpop.f32.mrb[87].mxu0  ;;  %v1661_v18 = vadd.f32 %v1533_v12, %v763_v9  ;;  %v1536_v19 = vadd.f32 %v1535_v16, %v1246_v14  ;;  %v1537_v20 = vpop.f32.mrb[87].mxu1 }
 0x236   : > { %1725 = vst [vmem:[%s2323_s8 + $0x150] sm:$0xff] %v1661_v18  ;;  %v1662_v21 = vadd.f32 %v1536_v19, %v764_v15  ;;  %v773_v15 = vld [vmem:[%s2323_s8 + $0x1a0] sm:$0xff] }
 0x238   : > { %1726 = vst [vmem:[%s2323_s8 + $0x158] sm:$0xff] %v1662_v21  ;;  %v774_v21 = vld [vmem:[%s2323_s8 + $0x1a8] sm:$0xff] }
 0x239   : > { %v1251_v22 = vpop.f32.mrb[88].mxu0  ;;  %v1540_v24 = vpop.f32.mrb[88].mxu1 }
 0x23a   : > { %v1253_v25 = vpop.f32.mrb[89].mxu0  ;;  %v1541_v26 = vadd.f32 %v1540_v24, %v1251_v22  ;;  %v1542_v27 = vpop.f32.mrb[89].mxu1 }
 0x23b   : > { %v1254_v28 = vpop.f32.mrb[90].mxu0  ;;  %v1543_v30 = vpop.f32.mrb[90].mxu1 }
 0x23c   : > { %v1256_v31 = vpop.f32.mrb[91].mxu0  ;;  %v1663_v32 = vadd.f32 %v1541_v26, %v765_v23  ;;  %v1544_v33 = vadd.f32 %v1543_v30, %v1254_v28  ;;  %v1545_v34 = vpop.f32.mrb[91].mxu1 }
 0x23e   : > { %1727 = vst [vmem:[%s2323_s8 + $0x160] sm:$0xff] %v1663_v32  ;;  %v1664_v35 = vadd.f32 %v1544_v33, %v766_v29  ;;  %v775_v29 = vld [vmem:[%s2323_s8 + $0x1b0] sm:$0xff] }
 0x240   : > { %1728 = vst [vmem:[%s2323_s8 + $0x168] sm:$0xff] %v1664_v35  ;;  %v776_v35 = vld [vmem:[%s2323_s8 + $0x1b8] sm:$0xff] }
 0x241   : > { %v1259_v36 = vpop.f32.mrb[92].mxu0  ;;  %v1548_v38 = vpop.f32.mrb[92].mxu1 }
 0x242   : > { %v1261_v39 = vpop.f32.mrb[93].mxu0  ;;  %v1549_v40 = vadd.f32 %v1548_v38, %v1259_v36  ;;  %v1550_v41 = vpop.f32.mrb[93].mxu1 }
 0x243   : > { %v1262_v42 = vpop.f32.mrb[94].mxu0  ;;  %v1551_v44 = vpop.f32.mrb[94].mxu1 }
 0x244   : > { %v1264_v45 = vpop.f32.mrb[95].mxu0  ;;  %v1665_v46 = vadd.f32 %v1549_v40, %v767_v37  ;;  %v1552_v47 = vadd.f32 %v1551_v44, %v1262_v42  ;;  %v1553_v48 = vpop.f32.mrb[95].mxu1 }
 0x246   : > { %1729 = vst [vmem:[%s2323_s8 + $0x170] sm:$0xff] %v1665_v46  ;;  %v1666_v49 = vadd.f32 %v1552_v47, %v768_v43  ;;  %v777_v43 = vld [vmem:[%s2323_s8 + $0x1c0] sm:$0xff] }
 0x248   : > { %1730 = vst [vmem:[%s2323_s8 + $0x178] sm:$0xff] %v1666_v49  ;;  %v778_v49 = vld [vmem:[%s2323_s8 + $0x1c8] sm:$0xff] }
 0x249   : > { %v1267_v50 = vpop.f32.mrb[96].mxu0  ;;  %v1556_v52 = vpop.f32.mrb[96].mxu1 }
 0x24a   : > { %v1269_v53 = vpop.f32.mrb[97].mxu0  ;;  %v1557_v54 = vadd.f32 %v1556_v52, %v1267_v50  ;;  %v1558_v55 = vpop.f32.mrb[97].mxu1 }
 0x24b   : > { %v1270_v56 = vpop.f32.mrb[98].mxu0  ;;  %v1559_v58 = vpop.f32.mrb[98].mxu1 }
 0x24c   : > { %v1272_v59 = vpop.f32.mrb[99].mxu0  ;;  %v1667_v60 = vadd.f32 %v1557_v54, %v769_v51  ;;  %v1560_v61 = vadd.f32 %v1559_v58, %v1270_v56  ;;  %v1561_v62 = vpop.f32.mrb[99].mxu1 }
 0x24e   : > { %1731 = vst [vmem:[%s2323_s8 + $0x180] sm:$0xff] %v1667_v60  ;;  %v1668_v63 = vadd.f32 %v1560_v61, %v770_v57  ;;  %v779_v57 = vld [vmem:[%s2323_s8 + $0x1d0] sm:$0xff] }
 0x250   : > { %1732 = vst [vmem:[%s2323_s8 + $0x188] sm:$0xff] %v1668_v63  ;;  %v780_v63 = vld [vmem:[%s2323_s8 + $0x1d8] sm:$0xff] }
 0x251   : > { %v1275_v0 = vpop.f32.mrb[100].mxu0  ;;  %v1564_v2 = vpop.f32.mrb[100].mxu1 }
 0x252   : > { %v1277_v3 = vpop.f32.mrb[101].mxu0  ;;  %v1565_v4 = vadd.f32 %v1564_v2, %v1275_v0  ;;  %v1566_v5 = vpop.f32.mrb[101].mxu1 }
 0x253   : > { %v1278_v6 = vpop.f32.mrb[102].mxu0  ;;  %v1567_v8 = vpop.f32.mrb[102].mxu1 }
 0x254   : > { %v1280_v9 = vpop.f32.mrb[103].mxu0  ;;  %v1669_v10 = vadd.f32 %v1565_v4, %v771_v1  ;;  %v1568_v11 = vadd.f32 %v1567_v8, %v1278_v6  ;;  %v1569_v12 = vpop.f32.mrb[103].mxu1 }
 0x256   : > { %1733 = vst [vmem:[%s2323_s8 + $0x190] sm:$0xff] %v1669_v10  ;;  %v1670_v13 = vadd.f32 %v1568_v11, %v772_v7  ;;  %v781_v7 = vld [vmem:[%s2323_s8 + $0x1e0] sm:$0xff] }
 0x258   : > { %1734 = vst [vmem:[%s2323_s8 + $0x198] sm:$0xff] %v1670_v13  ;;  %v782_v13 = vld [vmem:[%s2323_s8 + $0x1e8] sm:$0xff] }
 0x259   : > { %v1283_v14 = vpop.f32.mrb[104].mxu0  ;;  %v1572_v16 = vpop.f32.mrb[104].mxu1 }
 0x25a   : > { %v1285_v17 = vpop.f32.mrb[105].mxu0  ;;  %v1573_v18 = vadd.f32 %v1572_v16, %v1283_v14  ;;  %v1574_v19 = vpop.f32.mrb[105].mxu1 }
 0x25b   : > { %v1286_v20 = vpop.f32.mrb[106].mxu0  ;;  %v1575_v22 = vpop.f32.mrb[106].mxu1 }
 0x25c   : > { %v1288_v23 = vpop.f32.mrb[107].mxu0  ;;  %v1671_v24 = vadd.f32 %v1573_v18, %v773_v15  ;;  %v1576_v25 = vadd.f32 %v1575_v22, %v1286_v20  ;;  %v1577_v26 = vpop.f32.mrb[107].mxu1 }
 0x25e   : > { %1735 = vst [vmem:[%s2323_s8 + $0x1a0] sm:$0xff] %v1671_v24  ;;  %v1672_v27 = vadd.f32 %v1576_v25, %v774_v21  ;;  %v783_v21 = vld [vmem:[%s2323_s8 + $0x1f0] sm:$0xff] }
 0x260   : > { %1736 = vst [vmem:[%s2323_s8 + $0x1a8] sm:$0xff] %v1672_v27  ;;  %v784_v27 = vld [vmem:[%s2323_s8 + $0x1f8] sm:$0xff] }
 0x261   : > { %v1291_v28 = vpop.f32.mrb[108].mxu0  ;;  %v1580_v30 = vpop.f32.mrb[108].mxu1 }
 0x262   : > { %v1293_v31 = vpop.f32.mrb[109].mxu0  ;;  %v1581_v32 = vadd.f32 %v1580_v30, %v1291_v28  ;;  %v1582_v33 = vpop.f32.mrb[109].mxu1 }
 0x263   : > { %v1294_v34 = vpop.f32.mrb[110].mxu0  ;;  %v1583_v36 = vpop.f32.mrb[110].mxu1 }
 0x264   : > { %v1296_v37 = vpop.f32.mrb[111].mxu0  ;;  %v1673_v38 = vadd.f32 %v1581_v32, %v775_v29  ;;  %v1584_v39 = vadd.f32 %v1583_v36, %v1294_v34  ;;  %v1585_v40 = vpop.f32.mrb[111].mxu1 }
 0x266   : > { %1737 = vst [vmem:[%s2323_s8 + $0x1b0] sm:$0xff] %v1673_v38  ;;  %v1674_v41 = vadd.f32 %v1584_v39, %v776_v35 }
 0x268   : > { %1738 = vst [vmem:[%s2323_s8 + $0x1b8] sm:$0xff] %v1674_v41 }
 0x269   : > { %v1299_v42 = vpop.f32.mrb[112].mxu0  ;;  %v1588_v44 = vpop.f32.mrb[112].mxu1 }
 0x26a   : > { %v1301_v45 = vpop.f32.mrb[113].mxu0  ;;  %v1589_v46 = vadd.f32 %v1588_v44, %v1299_v42  ;;  %v1590_v47 = vpop.f32.mrb[113].mxu1 }
 0x26b   : > { %v1302_v48 = vpop.f32.mrb[114].mxu0  ;;  %v1591_v50 = vpop.f32.mrb[114].mxu1 }
 0x26c   : > { %v1304_v51 = vpop.f32.mrb[115].mxu0  ;;  %v1675_v52 = vadd.f32 %v1589_v46, %v777_v43  ;;  %v1592_v53 = vadd.f32 %v1591_v50, %v1302_v48  ;;  %v1593_v54 = vpop.f32.mrb[115].mxu1 }
 0x26e   : > { %1739 = vst [vmem:[%s2323_s8 + $0x1c0] sm:$0xff] %v1675_v52  ;;  %v1676_v55 = vadd.f32 %v1592_v53, %v778_v49 }
 0x270   : > { %1740 = vst [vmem:[%s2323_s8 + $0x1c8] sm:$0xff] %v1676_v55 }
 0x271   : > { %v1307_v56 = vpop.f32.mrb[116].mxu0  ;;  %v1596_v58 = vpop.f32.mrb[116].mxu1 }
 0x272   : > { %v1309_v59 = vpop.f32.mrb[117].mxu0  ;;  %v1597_v60 = vadd.f32 %v1596_v58, %v1307_v56  ;;  %v1598_v61 = vpop.f32.mrb[117].mxu1 }
 0x273   : > { %v1310_v62 = vpop.f32.mrb[118].mxu0  ;;  %v1599_v0 = vpop.f32.mrb[118].mxu1 }
 0x274   : > { %v1312_v1 = vpop.f32.mrb[119].mxu0  ;;  %v1677_v2 = vadd.f32 %v1597_v60, %v779_v57  ;;  %v1600_v3 = vadd.f32 %v1599_v0, %v1310_v62  ;;  %v1601_v4 = vpop.f32.mrb[119].mxu1 }
 0x276   : > { %1741 = vst [vmem:[%s2323_s8 + $0x1d0] sm:$0xff] %v1677_v2  ;;  %v1678_v5 = vadd.f32 %v1600_v3, %v780_v63 }
 0x278   : > { %1742 = vst [vmem:[%s2323_s8 + $0x1d8] sm:$0xff] %v1678_v5 }
 0x279   : > { %v1315_v6 = vpop.f32.mrb[120].mxu0  ;;  %v1604_v8 = vpop.f32.mrb[120].mxu1 }
 0x27a   : > { %v1317_v9 = vpop.f32.mrb[121].mxu0  ;;  %v1605_v10 = vadd.f32 %v1604_v8, %v1315_v6  ;;  %v1606_v11 = vpop.f32.mrb[121].mxu1 }
 0x27b   : > { %v1318_v12 = vpop.f32.mrb[122].mxu0  ;;  %v1607_v14 = vpop.f32.mrb[122].mxu1 }
 0x27c   : > { %v1320_v15 = vpop.f32.mrb[123].mxu0  ;;  %v1679_v16 = vadd.f32 %v1605_v10, %v781_v7  ;;  %v1608_v17 = vadd.f32 %v1607_v14, %v1318_v12  ;;  %v1609_v18 = vpop.f32.mrb[123].mxu1 }
 0x27e   : > { %1743 = vst [vmem:[%s2323_s8 + $0x1e0] sm:$0xff] %v1679_v16  ;;  %v1680_v19 = vadd.f32 %v1608_v17, %v782_v13 }
 0x280   : > { %1744 = vst [vmem:[%s2323_s8 + $0x1e8] sm:$0xff] %v1680_v19 }
 0x281   : > { %v1323_v20 = vpop.f32.mrb[124].mxu0  ;;  %v1612_v22 = vpop.f32.mrb[124].mxu1 }
 0x282   : > { %v1325_v23 = vpop.f32.mrb[125].mxu0  ;;  %v1613_v24 = vadd.f32 %v1612_v22, %v1323_v20  ;;  %v1614_v25 = vpop.f32.mrb[125].mxu1 }
 0x283   : > { %v1326_v26 = vpop.f32.mrb[126].mxu0  ;;  %v1615_v28 = vpop.f32.mrb[126].mxu1 }
 0x284   : > { %v1328_v29 = vpop.f32.mrb[127].mxu0  ;;  %v1681_v30 = vadd.f32 %v1613_v24, %v783_v21  ;;  %v1616_v31 = vadd.f32 %v1615_v28, %v1326_v26  ;;  %v1617_v32 = vpop.f32.mrb[127].mxu1 }
 0x286   : > { %1745 = vst [vmem:[%s2323_s8 + $0x1f0] sm:$0xff] %v1681_v30  ;;  %v1682_v33 = vadd.f32 %v1616_v31, %v784_v27 }
 0x288   : > { %1746 = vst [vmem:[%s2323_s8 + $0x1f8] sm:$0xff] %v1682_v33 }
 0x289 PF: > { %s16_s21 = sadd.s32 1, %s2143_s21   ;;  %s2957_s15 = sld [smem:[#allocation6_spill]] }
 0x28a   : > { %p13_p12 = scmp.ge.s32.totalorder %s16_s21, 10   ;;  %s2958_s18 = sld [smem:[#allocation7_spill]] }
 0x28b   : > { %s2959_s24 = sld [smem:[#allocation8_spill]]  ;;  %s2960_s12 = smov %s2111_s13 }
 0x28c   : > { %s2961_s13 = smov %s2115_s14  ;;  %s2962_s14 = smov %s2255_s22 }
 0x28d   : > { %s2963_s16 = smov %s2135_s19  ;;  %s2964_s17 = smov %s2139_s20 }
 0x28e   : > { %s2966_s20 = smov %s2976_s25  ;;  %15 = sbr.rel (!%p13_p12) target bundleno = 10 (0xa), region = 79 }
 0x291   : > { %s2965_s19 = smov %s2959_s24 }
 0x295   :  { %1769 = vsyncpa [#allocation3], 1 }
 0x296   :  { %1771 = vsyncpa [#allocation3 + $0x1], 1 }

</bundles_post_ra>
